<compile_context>
chip_gen: v7x
topology: tpu7x:2x2x1
jax: 0.10.0
libtpu: 0.0.40
codegen_flags: <defaults>
</compile_context>

<pallas_src>
import jax
import jax.numpy as jnp
from jax import lax
from jax.experimental import pallas as pl
from jax.experimental.pallas import tpu as pltpu


def _vdn_sum_kernel(q_ref, w_ref, out_ref):
    # q_ref:   (bR, 128*N)  lane-dense input tile
    # w_ref:   (128*N, 128) constant segmented-sum matrix (fetched once)
    # out_ref: (bR, 128)    lane-dense output tile
    out_ref[...] = jnp.dot(
        q_ref[...],
        w_ref[...],
        preferred_element_type=jnp.float32,
        precision=lax.Precision.HIGHEST,
    ).astype(out_ref.dtype)


def vdn_mixer_pallas(q_values: jax.Array, *, block_rows: int = 1024) -> jax.Array:
    """q_values: [T, B, 1, N] -> [T, B, 1] (sum over the agent axis) via Pallas.

    block_rows = number of 128-output groups per grid step (multiple of 16).
    """
    T, B, one, N = q_values.shape
    assert one == 1
    dtype = q_values.dtype
    itemsize = jnp.dtype(dtype).itemsize

    rows = T * B                       # total number of output elements
    Rp = pl.cdiv(rows, 128)            # 128-wide output groups
    Rp = pl.cdiv(Rp, 16) * 16          # sublane dim multiple of 16 (bf16-safe)
    rows_p = Rp * 128

    # Clamp the block so one (input tile + output tile) plus the constant W
    # stays ~<= 8 MiB; with double buffering this fits every generation's
    # default scoped VMEM with room to spare.
    w_bytes = 128 * N * 128 * itemsize
    bytes_per_group = 128 * (N + 1) * itemsize
    budget = 8 * 1024 * 1024
    bR = min(block_rows, max(16, (budget - w_bytes) // bytes_per_group))
    bR = max(16, (bR // 16) * 16)
    bR = min(bR, Rp)                   # never larger than the array itself

    # Lane-dense repack: free row-major view; zero-pad only the small tail
    # (skipped entirely when rows is already a multiple of Rp*128/Rp...).
    qflat = q_values.reshape(rows * N)
    if rows_p != rows:
        qflat = jnp.pad(qflat, (0, (rows_p - rows) * N))
    q2d = qflat.reshape(Rp, 128 * N)

    # Segmented-sum matrix: W[l, j] = 1 iff l // N == j  (0/1 exact in any dtype).
    w = ((jnp.arange(128 * N) // N)[:, None] == jnp.arange(128)[None, :]).astype(dtype)

    grid = (pl.cdiv(Rp, bR),)          # last block may be partial (reads padded,
                                       # writes masked) -> no whole-block padding.
    cost = pl.CostEstimate(
        flops=2 * Rp * 128 * N * 128,
        transcendentals=0,
        bytes_accessed=(Rp * 128 * N + Rp * 128 + 128 * N * 128) * itemsize,
    )
    out2d = pl.pallas_call(
        _vdn_sum_kernel,
        out_shape=jax.ShapeDtypeStruct((Rp, 128), dtype),
        grid=grid,
        in_specs=[
            pl.BlockSpec((bR, 128 * N), lambda i: (i, 0)),
            pl.BlockSpec((128 * N, 128), lambda i: (0, 0)),  # constant: DMA'd once
        ],
        out_specs=pl.BlockSpec((bR, 128), lambda i: (i, 0)),
        compiler_params=pltpu.CompilerParams(
            dimension_semantics=("parallel",),   # independent row blocks (v7x: 2 TCs)
            vmem_limit_bytes=32 * 1024 * 1024,
        ),
        cost_estimate=cost,
    )(q2d, w)

    return out2d.reshape(rows_p)[:rows].reshape(T, B, one)


def vdn_mixer(q_values: jax.Array, *, min_rows_for_pallas: int = 1024) -> jax.Array:
    """Public forward: dispatch tiny problems to XLA, large ones to Pallas."""
    T, B, one, N = q_values.shape
    if T * B < min_rows_for_pallas:
        # Kernel-launch + DMA setup overhead dominates for a few KB of data.
        return jnp.sum(q_values, axis=-1)
    return vdn_mixer_pallas(q_values)


if __name__ == "__main__":
    key = jax.random.PRNGKey(0)

    # Small shape consistent with the module: q_values [T, B, 1, N].
    T, B, N = 8, 2, 4
    q_small = jax.random.normal(key, (T, B, 1, N), dtype=jnp.float32)
    out_small = jax.block_until_ready(vdn_mixer_pallas(q_small))
    ref_small = jnp.sum(q_small, axis=-1)
    assert out_small.shape == (T, B, 1), out_small.shape
    assert jnp.allclose(out_small, ref_small, atol=1e-5, rtol=1e-5), "mismatch (small)"

    # Larger shape exercising the multi-block cdiv grid + partial last block +
    # row-tail padding path (rows = 4160, not a multiple of 128).
    T2, B2, N2 = 520, 8, 4
    q_big = jax.random.normal(jax.random.PRNGKey(0), (T2, B2, 1, N2), dtype=jnp.float32)
    out_big = jax.block_until_ready(vdn_mixer_pallas(q_big, block_rows=16))
    ref_big = jnp.sum(q_big, axis=-1)
    assert out_big.shape == (T2, B2, 1), out_big.shape
    assert jnp.allclose(out_big, ref_big, atol=1e-5, rtol=1e-5), "mismatch (big)"

    # bf16 path: MXU sums exactly in f32, result cast back to bf16.
    q_bf16 = jax.random.normal(jax.random.PRNGKey(1), (T2, B2, 1, N2), dtype=jnp.bfloat16)
    out_bf16 = jax.block_until_ready(vdn_mixer_pallas(q_bf16))
    ref_bf16 = jnp.sum(q_bf16.astype(jnp.float32), axis=-1).astype(jnp.bfloat16)
    assert jnp.allclose(out_bf16.astype(jnp.float32), ref_bf16.astype(jnp.float32),
                        atol=2e-2, rtol=2e-2), "mismatch (bf16)"

    # Public wrapper (small shapes take the XLA fast path).
    out_pub = jax.block_until_ready(vdn_mixer(q_small))
    assert jnp.allclose(out_pub, ref_small, atol=1e-6), "mismatch (wrapper)"

    print("KERNEL_OK")
</pallas_src>

<mosaic_0001>
module attributes {stable_mosaic.version = 11 : i64} {
  func.func @_vdn_sum_kernel(%arg0: i32, %arg1: memref<16x512xf32, #tpu.memory_space<vmem>>, %arg2: memref<512x128xf32, #tpu.memory_space<vmem>>, %arg3: memref<16x128xf32, #tpu.memory_space<vmem>>) attributes {dimension_semantics = [#tpu.dimension_semantics<parallel>], iteration_bounds = array<i64: 1>, scalar_prefetch = 0 : i64, scratch_operands = 0 : i64, tpu.core_type = #tpu.core_type<tc>, window_params = [{transform_indices = @transform_0, window_bounds = array<i64: 16, 512>}, {pipeline_mode = #tpu.pipeline_mode<synchronous>, transform_indices = @transform_1, window_bounds = array<i64: 512, 128>}, {transform_indices = @transform_2, window_bounds = array<i64: 16, 128>}]} {
    %c0 = arith.constant 0 : index
    %c0_0 = arith.constant 0 : index
    %0 = vector.load %arg1[%c0, %c0_0] : memref<16x512xf32, #tpu.memory_space<vmem>>, vector<16x512xf32>
    %c0_1 = arith.constant 0 : index
    %c0_2 = arith.constant 0 : index
    %1 = vector.load %arg2[%c0_1, %c0_2] : memref<512x128xf32, #tpu.memory_space<vmem>>, vector<512x128xf32>
    %cst = arith.constant dense<0.000000e+00> : vector<16x128xf32>
    %2 = tpu.matmul %0, %1, %cst {dimension_numbers = #tpu.dot_dimension_numbers<[1], [0], [0], [1], [0, 0, 1, 1], [], []>, precision = #tpu.contract_precision<fp32>} : vector<16x512xf32>, vector<512x128xf32>, vector<16x128xf32> -> vector<16x128xf32>
    %c0_3 = arith.constant 0 : index
    %c0_4 = arith.constant 0 : index
    %3 = vector.load %arg3[%c0_3, %c0_4] : memref<16x128xf32, #tpu.memory_space<vmem>>, vector<16x128xf32>
    tpu.vector_store %arg3[%c0_3, %c0_4], %2 {strides = array<i32>} : memref<16x128xf32, #tpu.memory_space<vmem>>, vector<16x128xf32>,
    return
  }
  func.func @transform_0(%arg0: i32) -> (i32, i32) {
    %c0_i32 = arith.constant 0 : i32
    %c0_i32_0 = arith.constant 0 : i32
    return %arg0, %c0_i32 : i32, i32
  }
  func.func @transform_1(%arg0: i32) -> (i32, i32) {
    %c0_i32 = arith.constant 0 : i32
    %c0_i32_0 = arith.constant 0 : i32
    %c0_i32_1 = arith.constant 0 : i32
    return %c0_i32, %c0_i32_0 : i32, i32
  }
  func.func @transform_2(%arg0: i32) -> (i32, i32) {
    %c0_i32 = arith.constant 0 : i32
    %c0_i32_0 = arith.constant 0 : i32
    return %arg0, %c0_i32 : i32, i32
  }
}

</mosaic_0001>

<bundles_post_ra>
// kernel: tpu_custom_call.1
= control target key start
LH: loop header
LB: loop body
LE: loop exit
PB: predicated region body
PF: predicated region fallthrough
CT: control target
= control target key end

     0   :  { %7 = vsyncpa [#allocation3], 0  ;;  %s3894_s0 = inlined_call_operand.hbm [shape: f32[16,512], index: 0, kind: input, shape index: {}]   ;;  %s3895_s1 = inlined_call_operand.hbm [shape: f32[512,128], index: 1, kind: input, shape index: {}]   ;;  %s3896_s2 = inlined_call_operand.hbm [shape: f32[16,128], index: 2, kind: output, shape index: {}]  }
   0x1   :  { %8 = vsyncpa [#allocation6], 0 }
   0x2   :  { %9 = vsyncpa [#allocation4], 0  ;;  %s2887_s9 = smov [#allocation2]   ;;  %s2815_s13 = scalar_lea.hbm %s3894_s0, 1024 }
   0x3   :  { %s15_s10 = sshll.u32 %s2887_s9, 4  ;;  %p2816_p0 = scmp.ne.s32.totalorder %s3894_s0, %s2815_s13  ;;  %s16_s10 = int_to_ptr.vmem [resolvable:$true] %s15_s10 }
   0x4   :  { %p2819_p1 = scmp.lt.u32.totalorder %s2815_s13, %s3894_s0 }
   0x6   :  { %p2821_p2 = pnand %p2819_p1, %p2816_p0 }
   0x8   :  { %2824 = shalt.err (!%p2821_p2)
}
   0x9   :  { %s2825_s18 = scalar_lea.vmem %s16_s10, 1024  ;;  %p2830_p4 = scmp.lt.s32.totalorder %s16_s10, %s16_s10 }
   0xa   :  { %p2826_p3 = scmp.ne.s32.totalorder %s16_s10, %s2825_s18  ;;  %p2831_p5 = scmp.lt.s32.totalorder %s2825_s18, %s2825_s18 }
   0xc   :  { %p2832_p6 = por %p2831_p5, %p2830_p4 }
   0xe   :  { %p2833_p7 = pnand %p2832_p6, %p2826_p3 }
  0x10   :  { %2836 = shalt.err (!%p2833_p7)
}
  0x11   :  { %s2888_s19 = smov 512   ;;  %s2889_s20 = smov 32  }
  0x12   :  { %21 = dma.hbm_to_vmem [thread:$0]  %s3894_s0, 1024, %s16_s10, [#allocation3], %s2888_s19, %s2888_s19, %s2889_s20  }
  0x13   :  { %s2890_s23 = smov [#allocation5]   ;;  %s2837_s27 = scalar_lea.hbm %s3895_s1, 8192 }
  0x14   :  { %s27_s24 = sshll.u32 %s2890_s23, 4  ;;  %p2838_p8 = scmp.ne.s32.totalorder %s3895_s1, %s2837_s27  ;;  %s28_s24 = int_to_ptr.vmem [resolvable:$true] %s27_s24 }
  0x15   :  { %p2841_p9 = scmp.lt.u32.totalorder %s2837_s27, %s3895_s1 }
  0x17   :  { %p2843_p10 = pnand %p2841_p9, %p2838_p8 }
  0x19   :  { %2846 = shalt.err (!%p2843_p10)
}
  0x1a   :  { %s2847_s4 = scalar_lea.vmem %s28_s24, 8192  ;;  %p2852_p12 = scmp.lt.s32.totalorder %s28_s24, %s28_s24 }
  0x1b   :  { %p2848_p11 = scmp.ne.s32.totalorder %s28_s24, %s2847_s4  ;;  %p2853_p13 = scmp.lt.s32.totalorder %s2847_s4, %s2847_s4 }
  0x1d   :  { %p2854_p0 = por %p2853_p13, %p2852_p12 }
  0x1f   :  { %p2855_p1 = pnand %p2854_p0, %p2848_p11 }
  0x21   :  { %2858 = shalt.err (!%p2855_p1)
}
  0x22   :  { %s2891_s0 = smov 128   ;;  %s2892_s5 = smov 8  }
  0x23   :  { %33 = dma.hbm_to_vmem [thread:$0]  %s3895_s1, 8192, %s28_s24, [#allocation6], %s2891_s0, %s2891_s0, %s2892_s5  }
  0x24   :  { %2881 = dma.done.wait [#allocation3], 1024  }
  0x25   :  { %2882 = vsyncadd [#allocation3], 4294966272 }
  0x26   :  { %2883 = dma.done.wait [#allocation6], 8192  }
  0x27   :  { %2884 = vsyncadd [#allocation6], 4294959104  ;;  %v64_v0 = vld [vmem:[#allocation5 + $0x80] sm:$0xff]  ;;  %v65_v1 = vld [vmem:[#allocation5 + $0x88] sm:$0xff]  ;;  %s2893_s1 = smov [#allocation7]  }
  0x28   :  { %v48_v2 = vld [vmem:[#allocation5] sm:$0xff]  ;;  %v161_v3 = vand.u32 4294901760, %v64_v0  ;;  %v164_v4 = vand.u32 4294901760, %v65_v1  ;;  %v49_v5 = vld [vmem:[#allocation5 + $0x8] sm:$0xff]  ;;  %v66_v7 = vld [vmem:[#allocation5 + $0x90] sm:$0xff]  ;;  %s1955_s8 = sshll.u32 %s2893_s1, 4  ;;  %s1956_s8 = int_to_ptr.vmem [resolvable:$true] %s1955_s8 }
  0x29   :  { %v113_v6 = vand.u32 4294901760, %v48_v2  ;;  %v67_v8 = vld [vmem:[#allocation5 + $0x98] sm:$0xff]  ;;  %v116_v9 = vand.u32 4294901760, %v49_v5  ;;  %v167_v10 = vand.u32 4294901760, %v66_v7  ;;  %v50_v12 = vld [vmem:[#allocation5 + $0x10] sm:$0xff]  ;;  %v68_v18 = vld [vmem:[#allocation5 + $0xa0] sm:$0xff]  ;;  %p2864_p3 = scmp.lt.s32.totalorder %s1956_s8, %s1956_s8 }
  0x2a   :  { %v170_v11 = vand.u32 4294901760, %v67_v8  ;;  %v51_v13 = vld [vmem:[#allocation5 + $0x18] sm:$0xff]  ;;  %v2936_v14 = vpack.c.bf16 %v164_v4, %v161_v3  ;;  %v119_v16 = vand.u32 4294901760, %v50_v12  ;;  %v69_v19 = vld [vmem:[#allocation5 + $0xa8] sm:$0xff]  ;;  %v52_v23 = vld [vmem:[#allocation5 + $0x20] sm:$0xff]  ;;  %v173_v29 = vand.u32 4294901760, %v68_v18 }
  0x2b   :  { %v2938_v15 = vsub.f32 %v48_v2, %v113_v6  ;;  %v122_v17 = vand.u32 4294901760, %v51_v13  ;;  %v2940_v20 = vpack.c.bf16 %v116_v9, %v113_v6  ;;  %v2942_v21 = vsub.f32 %v49_v5, %v116_v9  ;;  %v53_v24 = vld [vmem:[#allocation5 + $0x28] sm:$0xff]  ;;  %v70_v37 = vld [vmem:[#allocation5 + $0xb0] sm:$0xff]  ;;  %v71_v42 = vld [vmem:[#allocation5 + $0xb8] sm:$0xff]  ;;  %s2859_s9 = scalar_lea.vmem %s1956_s8, 256 }
  0x2c   :  { %v2944_v22 = vpack.c.bf16 %v170_v11, %v167_v10  ;;  %2425 = vmatprep.subr.bf16.mxu0 %v2936_v14  ;;  %v2947_v25 = vsub.f32 %v66_v7, %v167_v10  ;;  %v2949_v26 = vsub.f32 %v67_v8, %v170_v11  ;;  %v2953_v28 = vsub.f32 %v50_v12, %v119_v16  ;;  %v54_v55 = vld [vmem:[#allocation5 + $0x30] sm:$0xff]  ;;  %v55_v56 = vld [vmem:[#allocation5 + $0x38] sm:$0xff]  ;;  %v72_v5 = vld [vmem:[#allocation5 + $0xc0] sm:$0xff]  ;;  %p2860_p2 = scmp.ne.s32.totalorder %s1956_s8, %s2859_s9  ;;  %p2865_p4 = scmp.lt.s32.totalorder %s2859_s9, %s2859_s9 }
  0x2d   :  { %v2951_v27 = vpack.c.bf16 %v122_v17, %v119_v16  ;;  %2427 = vmatpush3.bf16.msra.mxu0 %v2940_v20  ;;  %v176_v30 = vand.u32 4294901760, %v69_v19  ;;  %v2956_v31 = vsub.f32 %v64_v0, %v161_v3  ;;  %v2958_v32 = vsub.f32 %v65_v1, %v164_v4  ;;  %v73_v6 = vld [vmem:[#allocation5 + $0xc8] sm:$0xff]  ;;  %v56_v11 = vld [vmem:[#allocation5 + $0x40] sm:$0xff] }
  0x2e   :  { %2429 = vmatprep.subr.bf16.mxu0 %v2944_v22  ;;  %v125_v33 = vand.u32 4294901760, %v52_v23  ;;  %v128_v34 = vand.u32 4294901760, %v53_v24  ;;  %v3912_v35 = vand.u32 4294901760, %v2938_v15  ;;  %v3911_v36 = vand.u32 4294901760, %v2942_v21  ;;  %p2866_p5 = por %p2865_p4, %p2864_p3 }
  0x2f   :  { %v2963_v38 = vsub.f32 %v51_v13, %v122_v17  ;;  %v2965_v39 = vpack.c.bf16 %v176_v30, %v173_v29  ;;  %v2967_v40 = vsub.f32 %v68_v18, %v173_v29  ;;  %v3916_v41 = vand.u32 4294901760, %v2956_v31  ;;  %v57_v29 = vld [vmem:[#allocation5 + $0x48] sm:$0xff] }
  0x30   :  { %v2970_v43 = vsub.f32 %v69_v19, %v176_v30  ;;  %v3914_v44 = vand.u32 4294901760, %v2958_v32  ;;  %v2973_v45 = vpack.c.bf16 %v128_v34, %v125_v33  ;;  %v2975_v46 = vsub.f32 %v52_v23, %v125_v33  ;;  %p2867_p6 = pnand %p2866_p5, %p2860_p2 }
  0x31   :  { %2431 = vmatpush3.bf16.msra.mxu0 %v2951_v27  ;;  %v355_v47 = vsub.f32 %v2956_v31, %v3916_v41  ;;  %v243_v48 = vsub.f32 %v2938_v15, %v3912_v35  ;;  %v250_v49 = vsub.f32 %v2942_v21, %v3911_v36  ;;  %v179_v50 = vand.u32 4294901760, %v70_v37  ;;  %v41_v41 = vld [vmem:[#allocation2 + $0x8] sm:$0xff] }
  0x32   :  { %2433 = vmatprep.subr.bf16.mxu0 %v2965_v39  ;;  %v362_v51 = vsub.f32 %v2958_v32, %v3914_v44  ;;  %v182_v52 = vand.u32 4294901760, %v71_v42  ;;  %v3909_v53 = vand.u32 4294901760, %v2947_v25  ;;  %v3907_v54 = vand.u32 4294901760, %v2949_v26 }
  0x33   :  { %v356_v57 = vand.u32 4294901760, %v355_v47  ;;  %v2993_v58 = vsub.f32 %v53_v24, %v128_v34  ;;  %v244_v59 = vand.u32 4294901760, %v243_v48  ;;  %v251_v60 = vand.u32 4294901760, %v250_v49 }
  0x34   :  { %v363_v61 = vand.u32 4294901760, %v362_v51  ;;  %v2995_v62 = vpack.c.bf16 %v182_v52, %v179_v50  ;;  %v2997_v63 = vsub.f32 %v70_v37, %v179_v50  ;;  %v369_v0 = vsub.f32 %v2947_v25, %v3909_v53 }
  0x35   :  { %2435 = vmatpush3.bf16.msra.mxu0 %v2973_v45  ;;  %v2458_v1 = vpack.c.bf16 %v251_v60, %v244_v59  ;;  %v376_v2 = vsub.f32 %v2949_v26, %v3907_v54  ;;  %v131_v3 = vand.u32 4294901760, %v54_v55  ;;  %v134_v4 = vand.u32 4294901760, %v55_v56  ;;  %v75_v59 = vld [vmem:[#allocation5 + $0xd8] sm:$0xff] }
  0x36   :  { %v2456_v7 = vpack.c.bf16 %v363_v61, %v356_v57  ;;  %2437 = vmatprep.subr.bf16.mxu0 %v2995_v62  ;;  %v370_v8 = vand.u32 4294901760, %v369_v0  ;;  %v3906_v9 = vand.u32 4294901760, %v2953_v28  ;;  %v3904_v10 = vand.u32 4294901760, %v2963_v38  ;;  %v74_v57 = vld [vmem:[#allocation5 + $0xd0] sm:$0xff]  ;;  %v79_v54 = vld [vmem:[#allocation5 + $0xf8] sm:$0xff] }
  0x37   :  { %v3009_v12 = vsub.f32 %v71_v42, %v182_v52  ;;  %v377_v13 = vand.u32 4294901760, %v376_v2  ;;  %v3011_v16 = vpack.c.bf16 %v134_v4, %v131_v3  ;;  %v3013_v17 = vsub.f32 %v54_v55, %v131_v3 }
  0x38   :  { %2457 = vmatprep.subr.bf16.mxu1 %v2456_v7  ;;  %v257_v18 = vsub.f32 %v2953_v28, %v3906_v9  ;;  %v264_v19 = vsub.f32 %v2963_v38, %v3904_v10  ;;  %v185_v23 = vand.u32 4294901760, %v72_v5  ;;  %v188_v24 = vand.u32 4294901760, %v73_v6  ;;  %v78_v9 = vld [vmem:[#allocation5 + $0xf0] sm:$0xff] }
  0x39   :  { %2459 = vmatpush3.bf16.msra.mxu1 %v2458_v1  ;;  %v2460_v30 = vpack.c.bf16 %v377_v13, %v370_v8  ;;  %2439 = vmatpush3.bf16.msra.mxu0 %v3011_v16  ;;  %v3902_v33 = vand.u32 4294901760, %v2967_v40  ;;  %v3901_v34 = vand.u32 4294901760, %v2970_v43  ;;  %v137_v37 = vand.u32 4294901760, %v56_v11  ;;  %v58_v1 = vld [vmem:[#allocation5 + $0x50] sm:$0xff] }
  0x3a   :  { %v3024_v42 = vsub.f32 %v55_v56, %v134_v4  ;;  %v258_v47 = vand.u32 4294901760, %v257_v18  ;;  %v265_v48 = vand.u32 4294901760, %v264_v19  ;;  %v3026_v49 = vpack.c.bf16 %v188_v24, %v185_v23  ;;  %v59_v18 = vld [vmem:[#allocation5 + $0x58] sm:$0xff] }
  0x3b   :  { %2461 = vmatprep.subr.bf16.mxu1 %v2460_v30  ;;  %v3028_v50 = vsub.f32 %v72_v5, %v185_v23  ;;  %v383_v51 = vsub.f32 %v2967_v40, %v3902_v33  ;;  %v390_v52 = vsub.f32 %v2970_v43, %v3901_v34  ;;  %v140_v55 = vand.u32 4294901760, %v57_v29 }
  0x3c   :  { %v2462_v56 = vpack.c.bf16 %v265_v48, %v258_v47  ;;  %2441 = vmatprep.subr.bf16.mxu0 %v3026_v49  ;;  %v3037_v60 = vsub.f32 %v73_v6, %v188_v24  ;;  %v3899_v61 = vand.u32 4294901760, %v2975_v46  ;;  %v3897_v0 = vand.u32 4294901760, %v2993_v58 }
  0x3d   :  { %v384_v2 = vand.u32 4294901760, %v383_v51  ;;  %v391_v3 = vand.u32 4294901760, %v390_v52  ;;  %v3041_v4 = vpack.c.bf16 %v140_v55, %v137_v37  ;;  %v3043_v5 = vsub.f32 %v56_v11, %v137_v37 }
  0x3e   :  { %2463 = vmatpush3.bf16.msra.mxu1 %v2462_v56  ;;  %v271_v7 = vsub.f32 %v2975_v46, %v3899_v61  ;;  %v278_v6 = vsub.f32 %v2993_v58, %v3897_v0  ;;  %v191_v8 = vand.u32 4294901760, %v74_v57  ;;  %v194_v13 = vand.u32 4294901760, %v75_v59  ;;  %v77_v0 = vld [vmem:[#allocation5 + $0xe8] sm:$0xff] }
  0x3f   :  { %v2464_v19 = vpack.c.bf16 %v391_v3, %v384_v2  ;;  %2443 = vmatpush3.bf16.msra.mxu0 %v3041_v4  ;;  %v3898_v23 = vand.u32 4294901760, %v2997_v63  ;;  %v3900_v11 = vand.u32 4294901760, %v3009_v12  ;;  %v143_v24 = vand.u32 4294901760, %v58_v1  ;;  %v76_v3 = vld [vmem:[#allocation5 + $0xe0] sm:$0xff] }
  0x40   :  { %v3054_v30 = vsub.f32 %v57_v29, %v140_v55  ;;  %v272_v37 = vand.u32 4294901760, %v271_v7  ;;  %v279_v47 = vand.u32 4294901760, %v278_v6  ;;  %v3056_v48 = vpack.c.bf16 %v194_v13, %v191_v8  ;;  %v60_v6 = vld [vmem:[#allocation5 + $0x60] sm:$0xff] }
  0x41   :  { %2465 = vmatprep.subr.bf16.mxu1 %v2464_v19  ;;  %v3058_v51 = vsub.f32 %v74_v57, %v191_v8  ;;  %v397_v52 = vsub.f32 %v2997_v63, %v3898_v23  ;;  %v404_v56 = vsub.f32 %v3009_v12, %v3900_v11  ;;  %v146_v2 = vand.u32 4294901760, %v59_v18  ;;  %v61_v11 = vld [vmem:[#allocation5 + $0x68] sm:$0xff] }
  0x42   :  { %3998 = vst [vmem:[#allocation11_spill] sm:$0xff] %v3056_v48  ;;  %v2466_v29 = vpack.c.bf16 %v279_v47, %v272_v37  ;;  %2445 = vmatprep.subr.bf16.mxu0 %v3056_v48  ;;  %v3067_v55 = vsub.f32 %v75_v59, %v194_v13  ;;  %v3903_v7 = vand.u32 4294901760, %v3013_v17  ;;  %v3905_v57 = vand.u32 4294901760, %v3024_v42 }
  0x43   :  { %v398_v8 = vand.u32 4294901760, %v397_v52  ;;  %v405_v19 = vand.u32 4294901760, %v404_v56  ;;  %v3071_v23 = vpack.c.bf16 %v146_v2, %v143_v24  ;;  %v3073_v61 = vsub.f32 %v58_v1, %v143_v24 }
  0x44   :  { %2467 = vmatpush3.bf16.msra.mxu1 %v2466_v29  ;;  %v285_v37 = vsub.f32 %v3013_v17, %v3903_v7  ;;  %v292_v59 = vsub.f32 %v3024_v42, %v3905_v57  ;;  %v197_v13 = vand.u32 4294901760, %v76_v3  ;;  %v200_v47 = vand.u32 4294901760, %v77_v0 }
  0x45   :  { %3999 = vst [vmem:[#allocation12_spill] sm:$0xff] %v3071_v23  ;;  %v2468_v34 = vpack.c.bf16 %v405_v19, %v398_v8  ;;  %2447 = vmatpush3.bf16.msra.mxu0 %v3071_v23  ;;  %v3908_v52 = vand.u32 4294901760, %v3028_v50  ;;  %v3910_v1 = vand.u32 4294901760, %v3037_v60  ;;  %v149_v24 = vand.u32 4294901760, %v60_v6  ;;  %v45_v23 = vld [vmem:[#allocation2 + $0x28] sm:$0xff] }
  0x46   :  { %v3084_v56 = vsub.f32 %v59_v18, %v146_v2  ;;  %v286_v29 = vand.u32 4294901760, %v285_v37  ;;  %v293_v33 = vand.u32 4294901760, %v292_v59  ;;  %v3086_v7 = vpack.c.bf16 %v200_v47, %v197_v13  ;;  %v62_v37 = vld [vmem:[#allocation5 + $0x70] sm:$0xff] }
  0x47   :  { %2469 = vmatprep.subr.bf16.mxu1 %v2468_v34  ;;  %v3088_v10 = vsub.f32 %v76_v3, %v197_v13  ;;  %v411_v8 = vsub.f32 %v3028_v50, %v3908_v52  ;;  %v418_v19 = vsub.f32 %v3037_v60, %v3910_v1  ;;  %v152_v57 = vand.u32 4294901760, %v61_v11  ;;  %v63_v1 = vld [vmem:[#allocation5 + $0x78] sm:$0xff] }
  0x48   :  { %4000 = vst [vmem:[#allocation13_spill] sm:$0xff] %v3086_v7  ;;  %v2470_v18 = vpack.c.bf16 %v293_v33, %v286_v29  ;;  %2449 = vmatprep.subr.bf16.mxu0 %v3086_v7  ;;  %v3097_v2 = vsub.f32 %v77_v0, %v200_v47  ;;  %v3913_v34 = vand.u32 4294901760, %v3043_v5  ;;  %v3915_v3 = vand.u32 4294901760, %v3054_v30 }
  0x49   :  { %v412_v59 = vand.u32 4294901760, %v411_v8  ;;  %v419_v13 = vand.u32 4294901760, %v418_v19  ;;  %v3101_v52 = vpack.c.bf16 %v152_v57, %v149_v24  ;;  %v3103_v53 = vsub.f32 %v60_v6, %v149_v24 }
  0x4a   :  { %2471 = vmatpush3.bf16.msra.mxu1 %v2470_v18  ;;  %v299_v33 = vsub.f32 %v3043_v5, %v3913_v34  ;;  %v306_v0 = vsub.f32 %v3054_v30, %v3915_v3  ;;  %v203_v47 = vand.u32 4294901760, %v78_v9  ;;  %v206_v29 = vand.u32 4294901760, %v79_v54 }
  0x4b   :  { %4001 = vst [vmem:[#allocation14_spill] sm:$0xff] %v3101_v52  ;;  %v2472_v36 = vpack.c.bf16 %v419_v13, %v412_v59  ;;  %2451 = vmatpush3.bf16.msra.mxu0 %v3101_v52  ;;  %v3919_v8 = vand.u32 4294901760, %v3058_v51  ;;  %v3920_v6 = vand.u32 4294901760, %v3067_v55  ;;  %v155_v24 = vand.u32 4294901760, %v62_v37 }
  0x4c   :  { %v3114_v19 = vsub.f32 %v61_v11, %v152_v57  ;;  %v300_v18 = vand.u32 4294901760, %v299_v33  ;;  %v307_v35 = vand.u32 4294901760, %v306_v0  ;;  %v3116_v34 = vpack.c.bf16 %v206_v29, %v203_v47 }
  0x4d   :  { %2473 = vmatprep.subr.bf16.mxu1 %v2472_v36  ;;  %v3118_v44 = vsub.f32 %v78_v9, %v203_v47  ;;  %v425_v59 = vsub.f32 %v3058_v51, %v3919_v8  ;;  %v432_v13 = vsub.f32 %v3067_v55, %v3920_v6  ;;  %v158_v3 = vand.u32 4294901760, %v63_v1  ;;  %v40_v9 = vld [vmem:[#allocation2] sm:$0xff] }
  0x4e   :  { %4002 = vst [vmem:[#allocation15_spill] sm:$0xff] %v3116_v34  ;;  %v2474_v52 = vpack.c.bf16 %v307_v35, %v300_v18  ;;  %2453 = vmatprep.subr.bf16.mxu0 %v3116_v34  ;;  %v3127_v11 = vsub.f32 %v79_v54, %v206_v29  ;;  %v3921_v57 = vand.u32 4294901760, %v3073_v61  ;;  %v3922_v36 = vand.u32 4294901760, %v3084_v56 }
  0x4f   :  { %v426_v33 = vand.u32 4294901760, %v425_v59  ;;  %v433_v0 = vand.u32 4294901760, %v432_v13  ;;  %v3131_v47 = vpack.c.bf16 %v158_v3, %v155_v24  ;;  %v3133_v8 = vsub.f32 %v62_v37, %v155_v24 }
  0x50   :  { %2475 = vmatpush3.bf16.msra.mxu1 %v2474_v52  ;;  %v313_v35 = vsub.f32 %v3073_v61, %v3921_v57  ;;  %v320_v54 = vsub.f32 %v3084_v56, %v3922_v36  ;;  %v3141_v29 = vand.u32 4294901760, %v41_v41  ;;  %v3925_v18 = vand.u32 4294901760, %v3088_v10 }
  0x51   :  { %4003 = vst [vmem:[#allocation16_spill] sm:$0xff] %v3131_v47  ;;  %v2476_v6 = vpack.c.bf16 %v433_v0, %v426_v33  ;;  %2455 = vmatpush3.bf16.msra.mxu0 %v3131_v47  ;;  %v3931_v59 = vand.u32 4294901760, %v3097_v2  ;;  %v2488_v52 = vpack.c.bf16 %v2958_v32, %v2956_v31  ;;  %v3148_v37 = vand.u32 4294901760, %v40_v9 }
  0x52   :  { %4004 = vst [vmem:[#allocation17_spill] sm:$0xff] %v3141_v29  ;;  %v314_v24 = vand.u32 4294901760, %v313_v35  ;;  %v321_v13 = vand.u32 4294901760, %v320_v54  ;;  %v3151_v57 = vsub.f32 %v41_v41, %v3141_v29  ;;  %v439_v36 = vsub.f32 %v3088_v10, %v3925_v18  ;;  %464 = vmatprep.mubr.f32.mxu1 %v3141_v29 }
  0x53   :  { %2477 = vmatprep.subr.bf16.mxu1 %v2476_v6  ;;  %v446_v33 = vsub.f32 %v3097_v2, %v3931_v59  ;;  %2489 = vmatprep.subr.bf16.mxu0 %v2488_v52  ;;  %v3161_v0 = vsub.f32 %v40_v9, %v3148_v37  ;;  %v3930_v35 = vand.u32 4294901760, %v3103_v53  ;;  %v3932_v41 = vand.u32 4294901760, %v3114_v19 }
  0x54   :  { %v3165_v54 = vsub.f32 %v63_v1, %v158_v3  ;;  %v2478_v47 = vpack.c.bf16 %v321_v13, %v314_v24  ;;  %v3933_v18 = vand.u32 4294901760, %v3151_v57  ;;  %v440_v34 = vand.u32 4294901760, %v439_v36 }
  0x55   :  { %4005 = vst [vmem:[#allocation18_spill] sm:$0xff] %v3161_v0  ;;  %v447_v29 = vand.u32 4294901760, %v446_v33  ;;  %v3938_v6 = vand.u32 4294901760, %v3161_v0  ;;  %v327_v52 = vsub.f32 %v3103_v53, %v3930_v35  ;;  %v334_v9 = vsub.f32 %v3114_v19, %v3932_v41 }
  0x56   :  { %2479 = vmatpush3.bf16.msra.mxu1 %v2478_v47  ;;  %v211_v1 = vsub.f32 %v3151_v57, %v3933_v18  ;;  %v2490_v3 = vpack.c.bf16 %v2942_v21, %v2938_v15  ;;  %v3939_v36 = vand.u32 4294901760, %v3118_v44  ;;  %v3940_v24 = vand.u32 4294901760, %v3127_v11 }
  0x57   :  { %v2480_v13 = vpack.c.bf16 %v447_v29, %v440_v34  ;;  %v217_v33 = vsub.f32 %v3161_v0, %v3938_v6  ;;  %v328_v35 = vand.u32 4294901760, %v327_v52  ;;  %v335_v59 = vand.u32 4294901760, %v334_v9 }
  0x58   :  { %v212_v41 = vand.u32 4294901760, %v211_v1  ;;  %v453_v47 = vsub.f32 %v3118_v44, %v3939_v36  ;;  %v460_v18 = vsub.f32 %v3127_v11, %v3940_v24  ;;  %v3942_v7 = vand.u32 4294901760, %v3133_v8 }
  0x59   :  { %2481 = vmatprep.subr.bf16.mxu1 %v2480_v13  ;;  %v218_v34 = vand.u32 4294901760, %v217_v33  ;;  %v2482_v29 = vpack.c.bf16 %v335_v59, %v328_v35  ;;  %v2492_v6 = vpack.c.bf16 %v2949_v26, %v2947_v25  ;;  %v3941_v52 = vand.u32 4294901760, %v3165_v54  ;;  %v44_v59 = vld [vmem:[#allocation2 + $0x20] sm:$0xff] }
  0x5a   :  { %213 = vmatprep.mubr.f32.mxu0 %v212_v41  ;;  %v454_v9 = vand.u32 4294901760, %v453_v47  ;;  %v461_v1 = vand.u32 4294901760, %v460_v18  ;;  %v341_v36 = vsub.f32 %v3133_v8, %v3942_v7  ;;  %v3201_v33 = vand.u32 4294901760, %v45_v23 }
  0x5b   :  { %219 = vmatmul.mubr.f32.vlgmr.msra.gmra.mrb[0].mxu0 %v218_v34  ;;  %2483 = vmatpush3.bf16.msra.mxu1 %v2482_v29  ;;  %v348_v13 = vsub.f32 %v3165_v54, %v3941_v52  ;;  %v2494_v41 = vpack.c.bf16 %v2963_v38, %v2953_v28  ;;  %v2496_v47 = vpack.c.bf16 %v2970_v43, %v2967_v40  ;;  %v3210_v29 = vand.u32 4294901760, %v44_v59 }
  0x5c   :  { %2491 = vmatpush3.bf16.msra.mxu0 %v2490_v3  ;;  %v2484_v35 = vpack.c.bf16 %v461_v1, %v454_v9  ;;  %v342_v24 = vand.u32 4294901760, %v341_v36  ;;  %v3208_v34 = vsub.f32 %v45_v23, %v3201_v33  ;;  %v2498_v3 = vpack.c.bf16 %v2993_v58, %v2975_v46 }
  0x5d   :  { %2493 = vmatprep.subr.bf16.mxu0 %v2492_v6  ;;  %v349_v18 = vand.u32 4294901760, %v348_v13  ;;  %v2500_v36 = vpack.c.bf16 %v3009_v12, %v2997_v63  ;;  %v4006_v9 = vand.u32 4294901760, %v2956_v31  ;;  %v4007_v6 = vand.u32 4294901760, %v2958_v32 }
  0x5e   :  { %2485 = vmatprep.subr.bf16.mxu1 %v2484_v35  ;;  %v225_v13 = vand.u32 4294901760, %v3208_v34  ;;  %v3222_v23 = vsub.f32 %v44_v59, %v3210_v29  ;;  %v4008_v35 = vand.u32 4294901760, %v2938_v15  ;;  %v4010_v7 = vand.u32 4294901760, %v2947_v25 }
  0x5f   :  { %v2486_v52 = vpack.c.bf16 %v349_v18, %v342_v24  ;;  %v2552_v1 = vpack.c.bf16 %v4007_v6, %v4006_v9  ;;  %v4009_v24 = vand.u32 4294901760, %v2942_v21  ;;  %v4011_v0 = vand.u32 4294901760, %v2949_v26 }
  0x60   :  { %2495 = vmatpush3.bf16.msra.mxu0 %v2494_v41  ;;  %v4012_v31 = vand.u32 4294901760, %v2953_v28  ;;  %v4013_v32 = vand.u32 4294901760, %v2963_v38  ;;  %v4014_v59 = vand.u32 4294901760, %v2967_v40  ;;  %v4015_v15 = vand.u32 4294901760, %v2970_v43 }
  0x61   :  { %v2554_v18 = vpack.c.bf16 %v4009_v24, %v4008_v35  ;;  %v3232_v48 = vpack.c.bf16 %v4011_v0, %v4010_v7  ;;  %2487 = vmatpush3.bf16.msra.mxu1 %v2486_v52  ;;  %2497 = vmatprep.subr.bf16.mxu0 %v2496_v47  ;;  %v4016_v25 = vand.u32 4294901760, %v2975_v46  ;;  %v4017_v26 = vand.u32 4294901760, %v2993_v58 }
  0x62   :  { %v3238_v41 = vpack.c.bf16 %v4013_v32, %v4012_v31  ;;  %v3244_v21 = vpack.c.bf16 %v4015_v15, %v4014_v59  ;;  %2521 = vmatprep.subr.bf16.mxu1 %v2936_v14  ;;  %v226_v28 = vsub.f32 %v3208_v34, %v225_v13  ;;  %v231_v38 = vand.u32 4294901760, %v3222_v23 }
  0x63   :  { %v3250_v7 = vpack.c.bf16 %v4017_v26, %v4016_v25  ;;  %v4018_v40 = vand.u32 4294901760, %v2997_v63  ;;  %v4019_v43 = vand.u32 4294901760, %v3009_v12  ;;  %v4020_v46 = vand.u32 4294901760, %v3013_v17  ;;  %v4028_v25 = vld [vmem:[#allocation12_spill] sm:$0xff]  ;;  %v96_v26 = vld [vmem:[#allocation5 + $0x180] sm:$0xff] }
  0x64   :  { %v4021_v58 = vand.u32 4294901760, %v3024_v42  ;;  %v4022_v47 = vand.u32 4294901760, %v3028_v50  ;;  %v4023_v9 = vand.u32 4294901760, %v3037_v60  ;;  %v4024_v35 = vand.u32 4294901760, %v3043_v5  ;;  %466 = vmatmul.mubr.f32.vlgmr.msra.gmra.mrb[0].mxu1 %v3148_v37  ;;  %2499 = vmatpush3.bf16.msra.mxu0 %v2498_v3 }
  0x65   :  { %v3261_v0 = vpack.c.bf16 %v4019_v43, %v4018_v40  ;;  %v4025_v63 = vand.u32 4294901760, %v3054_v30  ;;  %v2502_v12 = vpack.c.bf16 %v3024_v42, %v3013_v17  ;;  %v227_v31 = vand.u32 4294901760, %v226_v28  ;;  %2523 = vmatpush3.bf16.msra.mxu1 %v2940_v20  ;;  %2501 = vmatprep.subr.bf16.mxu0 %v2500_v36  ;;  %v4027_v36 = vld [vmem:[#allocation11_spill] sm:$0xff]  ;;  %v97_v28 = vld [vmem:[#allocation5 + $0x188] sm:$0xff]  ;;  %v4029_v40 = vld [vmem:[#allocation13_spill] sm:$0xff] }
  0x66   :  { %v3267_v52 = vpack.c.bf16 %v4021_v58, %v4020_v46  ;;  %v3273_v6 = vpack.c.bf16 %v4023_v9, %v4022_v47  ;;  %v232_v32 = vsub.f32 %v3222_v23, %v231_v38  ;;  %v2504_v59 = vpack.c.bf16 %v3037_v60, %v3028_v50  ;;  %2525 = vmatprep.subr.bf16.mxu1 %v2944_v22  ;;  %v4030_v43 = vld [vmem:[#allocation18_spill] sm:$0xff]  ;;  %v80_v46 = vld [vmem:[#allocation5 + $0x100] sm:$0xff] }
  0x67   :  { %v3279_v24 = vpack.c.bf16 %v4025_v63, %v4024_v35  ;;  %228 = vmatprep.mubr.f32.mxu0 %v227_v31  ;;  %471 = vmatprep.mubr.f32.mxu1 %v3201_v33  ;;  %v2506_v17 = vpack.c.bf16 %v3054_v30, %v3043_v5  ;;  %v2508_v42 = vpack.c.bf16 %v3067_v55, %v3058_v51  ;;  %v4026_v50 = vand.u32 4294901760, %v3151_v57  ;;  %v81_v58 = vld [vmem:[#allocation5 + $0x108] sm:$0xff]  ;;  %v4032_v63 = vld [vmem:[#allocation15_spill] sm:$0xff]  ;;  %v4033_v31 = vld [vmem:[#allocation17_spill] sm:$0xff] }
  0x68   :  { %v233_v15 = vand.u32 4294901760, %v232_v32  ;;  %2503 = vmatpush3.bf16.msra.mxu0 %v2502_v12  ;;  %473 = vmatmul.mubr.f32.gmra.mrb[2].mxu1 %v3210_v29  ;;  %v2510_v60 = vpack.c.bf16 %v3084_v56, %v3073_v61  ;;  %v2512_v5 = vpack.c.bf16 %v3097_v2, %v3088_v10  ;;  %v2514_v30 = vpack.c.bf16 %v3114_v19, %v3103_v53  ;;  %v4031_v35 = vld [vmem:[#allocation14_spill] sm:$0xff] }
  0x69   :  { %2527 = vmatpush3.bf16.msra.mxu1 %v2951_v27  ;;  %2505 = vmatprep.subr.bf16.mxu0 %v2504_v59  ;;  %v2518_v3 = vpack.c.bf16 %v3165_v54, %v3133_v8  ;;  %v1079_v47 = vand.u32 4294901760, %v96_v26  ;;  %v1082_v9 = vand.u32 4294901760, %v97_v28  ;;  %v1034_v12 = vand.u32 4294901760, %v81_v58  ;;  %v98_v59 = vld [vmem:[#allocation5 + $0x190] sm:$0xff] }
  0x6a   :  { %2529 = vmatprep.subr.bf16.mxu1 %v2965_v39  ;;  %234 = vmatmul.mubr.f32.gmra.mrb[2].mxu0 %v233_v15  ;;  %v99_v15 = vld [vmem:[#allocation5 + $0x198] sm:$0xff] }
  0x6b   :  { %608 = vmatprep.mubr.f32.mxu0 %v3151_v57  ;;  %724 = vmatprep.mubr.f32.mxu1 %v4026_v50  ;;  %v2516_v57 = vpack.c.bf16 %v3127_v11, %v3118_v44  ;;  %v3328_v32 = vsub.f32 %v96_v26, %v1079_v47  ;;  %v82_v50 = vld [vmem:[#allocation5 + $0x110] sm:$0xff]  ;;  %v4037_v26 = vand.u32 4294901760, %v4030_v43 }
  0x6c   :  { %2507 = vmatpush3.bf16.msra.mxu0 %v2506_v17  ;;  %v4034_v17 = vld [vmem:[#allocation16_spill] sm:$0xff] }
  0x6d   :  { %2531 = vmatpush3.bf16.msra.mxu1 %v2973_v45  ;;  %2509 = vmatprep.subr.bf16.mxu0 %v2508_v42  ;;  %v3337_v42 = vsub.f32 %v81_v58, %v1034_v12 }
  0x6e   :  { %2533 = vmatprep.subr.bf16.mxu1 %v2995_v62 }
  0x70   :  { %2511 = vmatpush3.bf16.msra.mxu0 %v2510_v60  ;;  %v4035_v60 = vand.u32 4294901760, %v3058_v51  ;;  %v4041_v51 = vand.u32 4294901760, %v3097_v2  ;;  %v4045_v2 = vand.u32 4294901760, %v3127_v11  ;;  %v3947_v11 = vand.u32 4294901760, %v3337_v42 }
  0x71   :  { %2535 = vmatpush3.bf16.msra.mxu1 %v3011_v16  ;;  %2513 = vmatprep.subr.bf16.mxu0 %v2512_v5  ;;  %v4036_v5 = vand.u32 4294901760, %v3067_v55  ;;  %v100_v55 = vld [vmem:[#allocation5 + $0x1a0] sm:$0xff] }
  0x72   :  { %2537 = vmatprep.subr.bf16.mxu1 %v3026_v49 }
  0x74   :  { %2515 = vmatpush3.bf16.msra.mxu0 %v2514_v30  ;;  %v2572_v30 = vpack.c.bf16 %v4036_v5, %v4035_v60  ;;  %v3957_v60 = vand.u32 4294901760, %v3328_v32 }
  0x75   :  { %2539 = vmatpush3.bf16.msra.mxu1 %v3041_v4  ;;  %2517 = vmatprep.subr.bf16.mxu0 %v2516_v57  ;;  %v1085_v57 = vand.u32 4294901760, %v98_v59 }
  0x76   :  { %2541 = vmatprep.subr.bf16.mxu1 %v4027_v36 }
  0x78   :  { %2519 = vmatpush3.bf16.msra.mxu0 %v2518_v3  ;;  %v1088_v3 = vand.u32 4294901760, %v99_v15 }
  0x79   :  { %2543 = vmatpush3.bf16.msra.mxu1 %v4028_v25  ;;  %2553 = vmatprep.subr.bf16.mxu0 %v2552_v1  ;;  %v1031_v1 = vand.u32 4294901760, %v80_v46 }
  0x7a   :  { %2545 = vmatprep.subr.bf16.mxu1 %v4029_v40 }
  0x7b   :  { %611 = vmatmul.mubr.f32.vlgmr.msra.gmra.mrb[4].mxu0 %v4030_v43 }
  0x7c   :  { %2555 = vmatpush3.bf16.msra.mxu0 %v2554_v18  ;;  %617 = vmatprep.mubr.f32.mxu0 %v3208_v34  ;;  %v3330_v18 = vsub.f32 %v97_v28, %v1082_v9  ;;  %v3383_v34 = vpack.c.bf16 %v1082_v9, %v1079_v47  ;;  %v1273_v47 = vsub.f32 %v3328_v32, %v3957_v60 }
  0x7d   :  { %2547 = vmatpush3.bf16.msra.mxu1 %v4031_v35  ;;  %2557 = vmatprep.subr.bf16.mxu0 %v3232_v48  ;;  %v3335_v48 = vsub.f32 %v80_v46, %v1031_v1  ;;  %v4040_v46 = vand.u32 4294901760, %v3088_v10  ;;  %v4044_v10 = vand.u32 4294901760, %v3118_v44 }
  0x7e   :  { %2549 = vmatprep.subr.bf16.mxu1 %v4032_v63  ;;  %v3953_v43 = vand.u32 4294901760, %v3330_v18  ;;  %4048 = vst [vmem:[#allocation11_spill] sm:$0xff] %v3383_v34 }
  0x7f   :  { %620 = vmatmul.mubr.f32.gmra.mrb[6].mxu0 %v3222_v23  ;;  %v3356_v58 = vpack.c.bf16 %v4041_v51, %v4040_v46  ;;  %v3373_v5 = vpack.c.bf16 %v4045_v2, %v4044_v10  ;;  %v3948_v44 = vand.u32 4294901760, %v3335_v48  ;;  %v3389_v46 = vsub.f32 %v98_v59, %v1085_v57 }
  0x80   :  { %2559 = vmatpush3.bf16.msra.mxu0 %v3238_v41  ;;  %905 = vmatprep.mubr.f32.mxu0 %v4033_v31  ;;  %v83_v41 = vld [vmem:[#allocation5 + $0x118] sm:$0xff]  ;;  %v3391_v51 = vsub.f32 %v99_v15, %v1088_v3  ;;  %v1280_v9 = vsub.f32 %v3330_v18, %v3953_v43 }
  0x81   :  { %2551 = vmatpush3.bf16.msra.mxu1 %v4034_v17  ;;  %2561 = vmatprep.subr.bf16.mxu0 %v3244_v21  ;;  %v4039_v21 = vand.u32 4294901760, %v3084_v56  ;;  %v4043_v56 = vand.u32 4294901760, %v3114_v19 }
  0x82   :  { %2585 = vmatprep.subr.bf16.mxu1 %v2936_v14  ;;  %v4038_v14 = vand.u32 4294901760, %v3073_v61  ;;  %v4042_v61 = vand.u32 4294901760, %v3103_v53  ;;  %v4047_v53 = vand.u32 4294901760, %v3165_v54  ;;  %v1281_v10 = vand.u32 4294901760, %v1280_v9 }
  0x84   :  { %728 = vmatmul.mubr.f32.vlgmr.msra.gmra.mrb[4].mxu1 %v4037_v26  ;;  %2563 = vmatpush3.bf16.msra.mxu0 %v3250_v7  ;;  %v3350_v28 = vpack.c.bf16 %v4039_v21, %v4038_v14  ;;  %v3367_v7 = vpack.c.bf16 %v4043_v56, %v4042_v61  ;;  %v1037_v26 = vand.u32 4294901760, %v82_v50  ;;  %v1040_v14 = vand.u32 4294901760, %v83_v41  ;;  %v101_v21 = vld [vmem:[#allocation5 + $0x1a8] sm:$0xff] }
  0x85   :  { %2587 = vmatpush3.bf16.msra.mxu1 %v2940_v20  ;;  %735 = vmatprep.mubr.f32.mxu1 %v225_v13  ;;  %v4046_v20 = vand.u32 4294901760, %v3133_v8  ;;  %v3387_v13 = vpack.c.bf16 %v1034_v12, %v1031_v1  ;;  %v85_v61 = vld [vmem:[#allocation5 + $0x128] sm:$0xff]  ;;  %v3396_v8 = vpack.c.bf16 %v1088_v3, %v1085_v57  ;;  %v1094_v54 = vand.u32 4294901760, %v101_v21  ;;  %v102_v1 = vld [vmem:[#allocation5 + $0x1b0] sm:$0xff]  ;;  %v43_v12 = vld [vmem:[#allocation2 + $0x18] sm:$0xff] }
  0x86   :  { %2565 = vmatprep.subr.bf16.mxu0 %v3261_v0  ;;  %2589 = vmatprep.subr.bf16.mxu1 %v2944_v22  ;;  %v1091_v0 = vand.u32 4294901760, %v100_v55  ;;  %v84_v22 = vld [vmem:[#allocation5 + $0x120] sm:$0xff]  ;;  %v3406_v23 = vpack.c.bf16 %v1040_v14, %v1037_v26  ;;  %v1046_v15 = vand.u32 4294901760, %v85_v61  ;;  %v1161_v57 = vsub.f32 %v3335_v48, %v3948_v44 }
  0x87   :  { %v3381_v19 = vpack.c.bf16 %v4047_v53, %v4046_v20  ;;  %4049 = vst [vmem:[#allocation12_spill] sm:$0xff] %v3387_v13  ;;  %4050 = vst [vmem:[#allocation13_spill] sm:$0xff] %v3396_v8  ;;  %v1043_v59 = vand.u32 4294901760, %v84_v22  ;;  %v3952_v3 = vand.u32 4294901760, %v3389_v46  ;;  %v1274_v56 = vand.u32 4294901760, %v1273_v47  ;;  %v87_v20 = vld [vmem:[#allocation5 + $0x138] sm:$0xff] }
  0x88   :  { %739 = vmatmul.mubr.f32.gmra.mrb[6].mxu1 %v231_v38  ;;  %2567 = vmatpush3.bf16.msra.mxu0 %v3267_v52  ;;  %v3408_v38 = vsub.f32 %v82_v50, %v1037_v26  ;;  %v3410_v52 = vsub.f32 %v83_v41, %v1040_v14  ;;  %v3420_v50 = vsub.f32 %v100_v55, %v1091_v0  ;;  %v1097_v41 = vand.u32 4294901760, %v102_v1  ;;  %v86_v14 = vld [vmem:[#allocation5 + $0x130] sm:$0xff] }
  0x89   :  { %2591 = vmatpush3.bf16.msra.mxu1 %v2951_v27  ;;  %2569 = vmatprep.subr.bf16.mxu0 %v3273_v6  ;;  %v1168_v27 = vsub.f32 %v3337_v42, %v3947_v11  ;;  %v103_v6 = vld [vmem:[#allocation5 + $0x1b8] sm:$0xff]  ;;  %v3427_v2 = vand.u32 4294901760, %v43_v12  ;;  %v3430_v26 = vsub.f32 %v101_v21, %v1094_v54  ;;  %v1162_v47 = vand.u32 4294901760, %v1161_v57  ;;  %v105_v57 = vld [vmem:[#allocation5 + $0x1c8] sm:$0xff] }
  0x8a   :  { %2593 = vmatprep.subr.bf16.mxu1 %v2965_v39  ;;  %1016 = vmatprep.mubr.f32.mxu1 %v4033_v31  ;;  %v3949_v39 = vand.u32 4294901760, %v3391_v51  ;;  %v3425_v31 = vpack.c.bf16 %v1094_v54, %v1091_v0  ;;  %v1100_v55 = vand.u32 4294901760, %v103_v6  ;;  %v3950_v53 = vand.u32 4294901760, %v3408_v38 }
  0x8b   :  { %4051 = vst [vmem:[#allocation18_spill] sm:$0xff] %v3427_v2  ;;  %v3951_v11 = vand.u32 4294901760, %v3410_v52  ;;  %v3437_v0 = vsub.f32 %v84_v22, %v1043_v59  ;;  %v1169_v9 = vand.u32 4294901760, %v1168_v27  ;;  %v3439_v44 = vsub.f32 %v85_v61, %v1046_v15 }
  0x8c   :  { %2571 = vmatpush3.bf16.msra.mxu0 %v3279_v24  ;;  %v3435_v24 = vpack.c.bf16 %v1046_v15, %v1043_v59  ;;  %v1294_v21 = vsub.f32 %v3391_v51, %v3949_v39  ;;  %v1049_v22 = vand.u32 4294901760, %v86_v14  ;;  %v1052_v54 = vand.u32 4294901760, %v87_v20  ;;  %v104_v59 = vld [vmem:[#allocation5 + $0x1c0] sm:$0xff] }
  0x8d   :  { %2595 = vmatpush3.bf16.msra.mxu1 %v2973_v45  ;;  %2573 = vmatprep.subr.bf16.mxu0 %v2572_v30  ;;  %v3441_v45 = vsub.f32 %v102_v1, %v1097_v41  ;;  %v1287_v30 = vsub.f32 %v3389_v46, %v3952_v3  ;;  %v3453_v61 = vsub.f32 %v43_v12, %v3427_v2  ;;  %v3472_v39 = vld [vmem:[#allocation5 + $0x140] sm:$0xff] }
  0x8e   :  { %2597 = vmatprep.subr.bf16.mxu1 %v2995_v62  ;;  %4052 = vst [vmem:[#allocation14_spill] sm:$0xff] %v3435_v24  ;;  %v3450_v62 = vpack.c.bf16 %v1281_v10, %v1274_v56  ;;  %v3457_v1 = vpack.c.bf16 %v1100_v55, %v1097_v41  ;;  %v1175_v15 = vsub.f32 %v3408_v38, %v3950_v53  ;;  %v1295_v56 = vand.u32 4294901760, %v1294_v21  ;;  %v3474_v53 = vld [vmem:[#allocation5 + $0x148] sm:$0xff] }
  0x8f   :  { %4053 = vst [vmem:[#allocation15_spill] sm:$0xff] %v3441_v45  ;;  %v3466_v27 = vpack.c.bf16 %v1169_v9, %v1162_v47  ;;  %v3468_v12 = vsub.f32 %v103_v6, %v1100_v55  ;;  %v1288_v41 = vand.u32 4294901760, %v1287_v30  ;;  %v1103_v10 = vand.u32 4294901760, %v104_v59 }
  0x90   :  { %2575 = vmatpush3.bf16.msra.mxu0 %v3350_v28  ;;  %4054 = vst [vmem:[#allocation17_spill] sm:$0xff] %v3457_v1  ;;  %v1182_v28 = vsub.f32 %v3410_v52, %v3951_v11  ;;  %v3954_v11 = vand.u32 4294901760, %v3437_v0  ;;  %v1106_v47 = vand.u32 4294901760, %v105_v57  ;;  %v3958_v6 = vand.u32 4294901760, %v3439_v44 }
  0x91   :  { %2599 = vmatpush3.bf16.msra.mxu1 %v3011_v16  ;;  %2577 = vmatprep.subr.bf16.mxu0 %v3356_v58  ;;  %4055 = vst [vmem:[#allocation16_spill] sm:$0xff] %v3468_v12  ;;  %v3956_v16 = vand.u32 4294901760, %v3420_v50  ;;  %v3955_v58 = vand.u32 4294901760, %v3430_v26  ;;  %v3959_v55 = vand.u32 4294901760, %v3453_v61  ;;  %v3484_v9 = vsub.f32 %v86_v14, %v1049_v22 }
  0x92   :  { %2601 = vmatprep.subr.bf16.mxu1 %v3026_v49  ;;  %v3478_v49 = vpack.c.bf16 %v1052_v54, %v1049_v22  ;;  %v3486_v30 = vsub.f32 %v87_v20, %v1052_v54  ;;  %v1176_v21 = vand.u32 4294901760, %v1175_v15  ;;  %v1183_v3 = vand.u32 4294901760, %v1182_v28  ;;  %v106_v22 = vld [vmem:[#allocation5 + $0x1d0] sm:$0xff] }
  0x93   :  { %4057 = vst [vmem:[#allocation20_spill] sm:$0xff] %v3484_v9  ;;  %v1308_v43 = vsub.f32 %v3430_v26, %v3955_v58  ;;  %v3497_v14 = vpack.c.bf16 %v1295_v56, %v1288_v41  ;;  %v1189_v20 = vsub.f32 %v3437_v0, %v3954_v11  ;;  %v3505_v15 = vpack.c.bf16 %v1106_v47, %v1103_v10  ;;  %v107_v56 = vld [vmem:[#allocation5 + $0x1d8] sm:$0xff] }
  0x94   :  { %2579 = vmatpush3.bf16.msra.mxu0 %v3367_v7  ;;  %4056 = vst [vmem:[#allocation19_spill] sm:$0xff] %v3478_v49  ;;  %4058 = vst [vmem:[#allocation21_spill] sm:$0xff] %v3486_v30  ;;  %v1301_v7 = vsub.f32 %v3420_v50, %v3956_v16  ;;  %v3507_v28 = vsub.f32 %v104_v59, %v1103_v10  ;;  %v1196_v41 = vsub.f32 %v3439_v44, %v3958_v6  ;;  %v90_v16 = vld [vmem:[#allocation5 + $0x150] sm:$0xff]  ;;  %v91_v59 = vld [vmem:[#allocation5 + $0x158] sm:$0xff] }
  0x95   :  { %2603 = vmatpush3.bf16.msra.mxu1 %v3041_v4  ;;  %2581 = vmatprep.subr.bf16.mxu0 %v3373_v5  ;;  %v1055_v4 = vand.u32 4294901760, %v3472_v39  ;;  %v1058_v5 = vand.u32 4294901760, %v3474_v53  ;;  %4059 = vst [vmem:[#allocation22_spill] sm:$0xff] %v3505_v15  ;;  %v1129_v11 = vsub.f32 %v3453_v61, %v3959_v55  ;;  %v3517_v58 = vpack.c.bf16 %v1183_v3, %v1176_v21 }
  0x96   :  { %2605 = vmatprep.subr.bf16.mxu1 %v4027_v36  ;;  %v1302_v6 = vand.u32 4294901760, %v1301_v7  ;;  %v1309_v54 = vand.u32 4294901760, %v1308_v43  ;;  %v1109_v55 = vand.u32 4294901760, %v106_v22  ;;  %v1112_v3 = vand.u32 4294901760, %v107_v56 }
  0x97   :  { %v3524_v36 = vpack.c.bf16 %v1058_v5, %v1055_v4  ;;  %v4062_v21 = vand.u32 4294901760, %v3468_v12  ;;  %v1061_v43 = vand.u32 4294901760, %v90_v16  ;;  %v1064_v7 = vand.u32 4294901760, %v91_v59 }
  0x98   :  { %2583 = vmatpush3.bf16.msra.mxu0 %v3381_v19  ;;  %v3519_v19 = vsub.f32 %v105_v57, %v1106_v47  ;;  %v4061_v57 = vand.u32 4294901760, %v3441_v45  ;;  %v1130_v60 = vand.u32 4294901760, %v1129_v11  ;;  %v3546_v11 = vpack.c.bf16 %v1309_v54, %v1302_v6 }
  0x99   :  { %2607 = vmatpush3.bf16.msra.mxu1 %v4028_v25  ;;  %2617 = vmatprep.subr.bf16.mxu0 %v3383_v34  ;;  %4060 = vst [vmem:[#allocation23_spill] sm:$0xff] %v3524_v36  ;;  %v1190_v25 = vand.u32 4294901760, %v1189_v20  ;;  %v1322_v10 = vsub.f32 %v3468_v12, %v4062_v21  ;;  %v4063_v20 = vand.u32 4294901760, %v3484_v9  ;;  %v108_v12 = vld [vmem:[#allocation5 + $0x1e0] sm:$0xff] }
  0x9a   :  { %2609 = vmatprep.subr.bf16.mxu1 %v4029_v40  ;;  %v1315_v47 = vsub.f32 %v3441_v45, %v4061_v57  ;;  %v1197_v40 = vand.u32 4294901760, %v1196_v41  ;;  %v4064_v45 = vand.u32 4294901760, %v3486_v30 }
  0x9b   :  { %907 = vmatmul.mubr.f32.vlgmr.msra.gmra.mrb[8].mxu0 %v3148_v37  ;;  %v1203_v57 = vsub.f32 %v3484_v9, %v4063_v20  ;;  %v3554_v20 = vsub.f32 %v106_v22, %v1109_v55  ;;  %v1323_v41 = vand.u32 4294901760, %v1322_v10  ;;  %v92_v9 = vld [vmem:[#allocation5 + $0x160] sm:$0xff]  ;;  %v4066_v22 = vand.u32 4294901760, %v3507_v28 }
  0x9c   :  { %2619 = vmatpush3.bf16.msra.mxu0 %v3387_v13  ;;  %912 = vmatprep.mubr.f32.mxu0 %v3201_v33  ;;  %v1210_v21 = vsub.f32 %v3486_v30, %v4064_v45  ;;  %v109_v13 = vld [vmem:[#allocation5 + $0x1e8] sm:$0xff]  ;;  %v3557_v45 = vpack.c.bf16 %v1112_v3, %v1109_v55  ;;  %v3559_v30 = vsub.f32 %v107_v56, %v1112_v3  ;;  %v1316_v34 = vand.u32 4294901760, %v1315_v47  ;;  %v3578_v47 = vld [vmem:[#allocation5 + $0x1f0] sm:$0xff] }
  0x9d   :  { %2611 = vmatpush3.bf16.msra.mxu1 %v4031_v35  ;;  %2621 = vmatprep.subr.bf16.mxu0 %v3396_v8  ;;  %v3549_v35 = vsub.f32 %v3472_v39, %v1055_v4  ;;  %v3552_v8 = vsub.f32 %v3474_v53, %v1058_v5  ;;  %v3562_v6 = vpack.c.bf16 %v1197_v40, %v1190_v25  ;;  %v1115_v53 = vand.u32 4294901760, %v108_v12 }
  0x9e   :  { %2613 = vmatprep.subr.bf16.mxu1 %v4032_v63  ;;  %4065 = vst [vmem:[#allocation24_spill] sm:$0xff] %v3557_v45  ;;  %v93_v63 = vld [vmem:[#allocation5 + $0x168] sm:$0xff]  ;;  %v3564_v39 = vpack.c.bf16 %v1064_v7, %v1061_v43  ;;  %v1118_v4 = vand.u32 4294901760, %v109_v13  ;;  %v1204_v55 = vand.u32 4294901760, %v1203_v57  ;;  %v1211_v5 = vand.u32 4294901760, %v1210_v21  ;;  %v47_v21 = vld [vmem:[#allocation2 + $0x38] sm:$0xff] }
  0x9f   :  { %914 = vmatmul.mubr.f32.gmra.mrb[10].mxu0 %v3210_v29  ;;  %v1329_v54 = vsub.f32 %v3507_v28, %v4066_v22  ;;  %v4067_v56 = vand.u32 4294901760, %v3519_v19  ;;  %v3575_v25 = vsub.f32 %v90_v16, %v1061_v43  ;;  %v1067_v3 = vand.u32 4294901760, %v92_v9  ;;  %v3585_v22 = vld [vmem:[#allocation5 + $0x1f8] sm:$0xff] }
  0xa0   :  { %2623 = vmatpush3.bf16.msra.mxu0 %v3406_v23  ;;  %1131 = vmatprep.mubr.f32.mxu0 %v1130_v60  ;;  %v1070_v60 = vand.u32 4294901760, %v93_v63  ;;  %v3580_v40 = vpack.c.bf16 %v1323_v41, %v1316_v34  ;;  %v3582_v57 = vsub.f32 %v91_v59, %v1064_v7  ;;  %v3592_v16 = vsub.f32 %v108_v12, %v1115_v53  ;;  %v42_v59 = vld [vmem:[#allocation2 + $0x10] sm:$0xff] }
  0xa1   :  { %2615 = vmatpush3.bf16.msra.mxu1 %v4034_v17  ;;  %2625 = vmatprep.subr.bf16.mxu0 %v3425_v31  ;;  %v1336_v10 = vsub.f32 %v3519_v19, %v4067_v56  ;;  %v3974_v17 = vand.u32 4294901760, %v3549_v35  ;;  %v3594_v43 = vsub.f32 %v109_v13, %v1118_v4  ;;  %v3979_v34 = vand.u32 4294901760, %v3559_v30 }
  0xa2   :  { %2649 = vmatprep.subr.bf16.mxu1 %v3450_v62  ;;  %v3590_v62 = vpack.c.bf16 %v1118_v4, %v1115_v53  ;;  %4068 = vst [vmem:[#allocation25_spill] sm:$0xff] %v3592_v16  ;;  %v3599_v7 = vpack.c.bf16 %v1211_v5, %v1204_v55  ;;  %v1330_v41 = vand.u32 4294901760, %v1329_v54  ;;  %v3604_v13 = vpack.c.bf16 %v1070_v60, %v1067_v3  ;;  %v3612_v53 = vld [vmem:[#allocation5 + $0x170] sm:$0xff]  ;;  %v3614_v4 = vld [vmem:[#allocation5 + $0x178] sm:$0xff] }
  0xa3   :  { %v1337_v56 = vand.u32 4294901760, %v1336_v10  ;;  %v3606_v12 = vsub.f32 %v92_v9, %v1067_v3  ;;  %v3616_v55 = vsub.f32 %v93_v63, %v1070_v60  ;;  %v4069_v5 = vand.u32 4294901760, %v3552_v8 }
  0xa4   :  { %1018 = vmatmul.mubr.f32.vlgmr.msra.gmra.mrb[8].mxu1 %v3148_v37  ;;  %2627 = vmatpush3.bf16.msra.mxu0 %v3435_v24  ;;  %v1121_v37 = vand.u32 4294901760, %v3578_v47  ;;  %v4070_v54 = vand.u32 4294901760, %v3554_v20  ;;  %v3624_v10 = vand.u32 4294901760, %v42_v59  ;;  %v1350_v3 = vsub.f32 %v3559_v30, %v3979_v34 }
  0xa5   :  { %2651 = vmatpush3.bf16.msra.mxu1 %v3466_v27  ;;  %1023 = vmatprep.mubr.f32.mxu1 %v3201_v33  ;;  %v1217_v27 = vsub.f32 %v3549_v35, %v3974_v17  ;;  %v1124_v33 = vand.u32 4294901760, %v3585_v22  ;;  %v3633_v17 = vand.u32 4294901760, %v47_v21  ;;  %v4072_v63 = vand.u32 4294901760, %v3582_v57 }
  0xa6   :  { %2629 = vmatprep.subr.bf16.mxu0 %v3457_v1  ;;  %2653 = vmatprep.subr.bf16.mxu1 %v3497_v14  ;;  %v1224_v14 = vsub.f32 %v3552_v8, %v4069_v5  ;;  %v1343_v9 = vsub.f32 %v3554_v20, %v4070_v54  ;;  %v46_v5 = vld [vmem:[#allocation2 + $0x30] sm:$0xff]  ;;  %v2664_v54 = vpack.c.bf16 %v1337_v56, %v1330_v41  ;;  %v1076_v1 = vand.u32 4294901760, %v3614_v4 }
  0xa7   :  { %v1218_v34 = vand.u32 4294901760, %v1217_v27  ;;  %v3644_v60 = vsub.f32 %v3585_v22, %v1124_v33  ;;  %v4071_v27 = vand.u32 4294901760, %v3575_v25 }
  0xa8   :  { %1025 = vmatmul.mubr.f32.gmra.mrb[10].mxu1 %v3210_v29  ;;  %2631 = vmatpush3.bf16.msra.mxu0 %v3478_v49  ;;  %v3638_v29 = vsub.f32 %v3578_v47, %v1121_v37  ;;  %v1073_v49 = vand.u32 4294901760, %v3612_v53  ;;  %v1225_v56 = vand.u32 4294901760, %v1224_v14  ;;  %v1344_v41 = vand.u32 4294901760, %v1343_v9 }
  0xa9   :  { %2655 = vmatpush3.bf16.msra.mxu1 %v3517_v58  ;;  %2633 = vmatprep.subr.bf16.mxu0 %v3505_v15  ;;  %v3650_v47 = vsub.f32 %v42_v59, %v3624_v10  ;;  %v3652_v15 = vand.u32 4294901760, %v46_v5  ;;  %v1231_v22 = vsub.f32 %v3575_v25, %v4071_v27  ;;  %v1238_v58 = vsub.f32 %v3582_v57, %v4072_v63 }
  0xaa   :  { %2657 = vmatprep.subr.bf16.mxu1 %v3546_v11  ;;  %1382 = vmatprep.mubr.f32.mxu1 %v3427_v2  ;;  %v1351_v11 = vand.u32 4294901760, %v1350_v3  ;;  %v3662_v2 = vsub.f32 %v47_v21, %v3633_v17  ;;  %v3667_v59 = vsub.f32 %v3612_v53, %v1073_v49  ;;  %v3670_v14 = vsub.f32 %v3614_v4, %v1076_v1 }
  0xab   :  { %v4073_v63 = vand.u32 4294901760, %v3592_v16  ;;  %v3993_v53 = vand.u32 4294901760, %v3638_v29  ;;  %v2666_v4 = vpack.c.bf16 %v1225_v56, %v1218_v34  ;;  %v3994_v9 = vand.u32 4294901760, %v3650_v47 }
  0xac   :  { %2635 = vmatpush3.bf16.msra.mxu0 %v3524_v36  ;;  %v3683_v36 = vpack.c.bf16 %v1124_v33, %v1121_v37  ;;  %v3687_v3 = vsub.f32 %v46_v5, %v3652_v15  ;;  %v3995_v24 = vand.u32 4294901760, %v3662_v2  ;;  %v4075_v34 = vand.u32 4294901760, %v3606_v12 }
  0xad   :  { %2659 = vmatpush3.bf16.msra.mxu1 %v3562_v6  ;;  %2637 = vmatprep.subr.bf16.mxu0 %v3557_v45  ;;  %v1357_v21 = vsub.f32 %v3592_v16, %v4073_v63  ;;  %v4074_v6 = vand.u32 4294901760, %v3594_v43  ;;  %v3992_v45 = vand.u32 4294901760, %v3644_v60  ;;  %v1232_v63 = vand.u32 4294901760, %v1231_v22 }
  0xae   :  { %2661 = vmatprep.subr.bf16.mxu1 %v3580_v40  ;;  %v2668_v40 = vpack.c.bf16 %v1351_v11, %v1344_v41  ;;  %v1239_v16 = vand.u32 4294901760, %v1238_v58  ;;  %v1245_v37 = vsub.f32 %v3606_v12, %v4075_v34  ;;  %v4076_v33 = vand.u32 4294901760, %v3616_v55 }
  0xaf   :  { %v1364_v27 = vsub.f32 %v3594_v43, %v4074_v6  ;;  %v3996_v56 = vand.u32 4294901760, %v3667_v59  ;;  %v3997_v41 = vand.u32 4294901760, %v3670_v14  ;;  %v1358_v58 = vand.u32 4294901760, %v1357_v21 }
  0xb0   :  { %2639 = vmatpush3.bf16.msra.mxu0 %v3564_v39  ;;  %v1252_v5 = vsub.f32 %v3616_v55, %v4076_v33  ;;  %v1378_v22 = vsub.f32 %v3644_v60, %v3992_v45  ;;  %v1135_v6 = vsub.f32 %v3650_v47, %v3994_v9  ;;  %v3712_v33 = vpack.c.bf16 %v1076_v1, %v1073_v49 }
  0xb1   :  { %2663 = vmatpush3.bf16.msra.mxu1 %v3599_v7  ;;  %2641 = vmatprep.subr.bf16.mxu0 %v3590_v62  ;;  %v1365_v11 = vand.u32 4294901760, %v1364_v27  ;;  %v1371_v7 = vsub.f32 %v3638_v29, %v3993_v53  ;;  %v2680_v21 = vpack.c.bf16 %v3330_v18, %v3328_v32  ;;  %v1144_v27 = vsub.f32 %v3662_v2, %v3995_v24 }
  0xb2   :  { %2665 = vmatprep.subr.bf16.mxu1 %v2664_v54  ;;  %v2670_v54 = vpack.c.bf16 %v1239_v16, %v1232_v63  ;;  %v1246_v45 = vand.u32 4294901760, %v1245_v37  ;;  %v1253_v53 = vand.u32 4294901760, %v1252_v5  ;;  %v1259_v9 = vsub.f32 %v3667_v59, %v3996_v56 }
  0xb3   :  { %v1266_v1 = vsub.f32 %v3670_v14, %v3997_v41  ;;  %v2672_v49 = vpack.c.bf16 %v1365_v11, %v1358_v58  ;;  %v1372_v16 = vand.u32 4294901760, %v1371_v7  ;;  %v1379_v63 = vand.u32 4294901760, %v1378_v22 }
  0xb4   :  { %2643 = vmatpush3.bf16.msra.mxu0 %v3604_v13  ;;  %v1136_v34 = vand.u32 4294901760, %v1135_v6  ;;  %v4077_v24 = vand.u32 4294901760, %v3687_v3  ;;  %v2682_v37 = vpack.c.bf16 %v3337_v42, %v3335_v48  ;;  %v1145_v5 = vand.u32 4294901760, %v1144_v27  ;;  %v4082_v27 = vld [vmem:[#allocation21_spill] sm:$0xff] }
  0xb5   :  { %2667 = vmatpush3.bf16.msra.mxu1 %v2666_v4  ;;  %2645 = vmatprep.subr.bf16.mxu0 %v3683_v36  ;;  %v2674_v56 = vpack.c.bf16 %v1253_v53, %v1246_v45  ;;  %v1260_v58 = vand.u32 4294901760, %v1259_v9  ;;  %v1267_v11 = vand.u32 4294901760, %v1266_v1  ;;  %v2676_v7 = vpack.c.bf16 %v1379_v63, %v1372_v16  ;;  %v4078_v53 = vld [vmem:[#allocation11_spill] sm:$0xff]  ;;  %v4084_v63 = vld [vmem:[#allocation13_spill] sm:$0xff] }
  0xb6   :  { %2669 = vmatprep.subr.bf16.mxu1 %v2668_v40  ;;  %v1150_v4 = vsub.f32 %v3687_v3, %v4077_v24  ;;  %v2684_v40 = vpack.c.bf16 %v3391_v51, %v3389_v46  ;;  %v2686_v24 = vpack.c.bf16 %v3410_v52, %v3408_v38  ;;  %v2688_v45 = vpack.c.bf16 %v3430_v26, %v3420_v50 }
  0xb7   :  { %v2678_v6 = vpack.c.bf16 %v1267_v11, %v1260_v58  ;;  %v2690_v9 = vpack.c.bf16 %v3439_v44, %v3437_v0  ;;  %v2696_v16 = vpack.c.bf16 %v3519_v19, %v3507_v28  ;;  %v4086_v58 = vld [vmem:[#allocation14_spill] sm:$0xff]  ;;  %v4087_v11 = vld [vmem:[#allocation25_spill] sm:$0xff] }
  0xb8   :  { %2647 = vmatpush3.bf16.msra.mxu0 %v3712_v33  ;;  %v1151_v22 = vand.u32 4294901760, %v1150_v4  ;;  %v2698_v4 = vpack.c.bf16 %v3552_v8, %v3549_v35 }
  0xb9   :  { %2671 = vmatpush3.bf16.msra.mxu1 %v2670_v54  ;;  %2681 = vmatprep.subr.bf16.mxu0 %v2680_v21  ;;  %v4080_v54 = vld [vmem:[#allocation16_spill] sm:$0xff] }
  0xba   :  { %2673 = vmatprep.subr.bf16.mxu1 %v2672_v49  ;;  %v4081_v21 = vld [vmem:[#allocation20_spill] sm:$0xff] }
  0xbb   :  { %1137 = vmatmul.mubr.f32.vlgmr.msra.gmra.mrb[12].mxu0 %v1136_v34  ;;  %v4079_v34 = vld [vmem:[#allocation15_spill] sm:$0xff]  ;;  %v2694_v1 = vpack.c.bf16 %v4082_v27, %v4081_v21  ;;  %v4083_v49 = vld [vmem:[#allocation12_spill] sm:$0xff] }
  0xbc   :  { %2683 = vmatpush3.bf16.msra.mxu0 %v2682_v37  ;;  %1146 = vmatprep.mubr.f32.mxu0 %v1145_v5  ;;  %v2700_v37 = vpack.c.bf16 %v3559_v30, %v3554_v20  ;;  %v4085_v5 = vand.u32 4294901760, %v3453_v61 }
  0xbd   :  { %2675 = vmatpush3.bf16.msra.mxu1 %v2674_v56  ;;  %2685 = vmatprep.subr.bf16.mxu0 %v2684_v40  ;;  %v2692_v56 = vpack.c.bf16 %v4080_v54, %v4079_v34  ;;  %v2702_v40 = vpack.c.bf16 %v3582_v57, %v3575_v25 }
  0xbe   :  { %2677 = vmatprep.subr.bf16.mxu1 %v2676_v7  ;;  %v2704_v7 = vpack.c.bf16 %v3594_v43, %v4087_v11 }
  0xbf   :  { %1152 = vmatmul.mubr.f32.gmra.mrb[14].mxu0 %v1151_v22  ;;  %v4088_v22 = vld [vmem:[#allocation17_spill] sm:$0xff] }
  0xc0   :  { %2687 = vmatpush3.bf16.msra.mxu0 %v2686_v24  ;;  %1526 = vmatprep.mubr.f32.mxu0 %v3453_v61  ;;  %v2706_v24 = vpack.c.bf16 %v3616_v55, %v3606_v12  ;;  %v2708_v61 = vpack.c.bf16 %v3644_v60, %v3638_v29 }
  0xc1   :  { %2679 = vmatpush3.bf16.msra.mxu1 %v2678_v6  ;;  %2689 = vmatprep.subr.bf16.mxu0 %v2688_v45  ;;  %v4089_v6 = vld [vmem:[#allocation19_spill] sm:$0xff]  ;;  %v4090_v45 = vld [vmem:[#allocation22_spill] sm:$0xff] }
  0xc2   :  { %2713 = vmatprep.subr.bf16.mxu1 %v4078_v53 }
  0xc4   :  { %1384 = vmatmul.mubr.f32.vlgmr.msra.gmra.mrb[12].mxu1 %v3624_v10  ;;  %2691 = vmatpush3.bf16.msra.mxu0 %v2690_v9  ;;  %v2710_v9 = vpack.c.bf16 %v3670_v14, %v3667_v59 }
  0xc5   :  { %2715 = vmatpush3.bf16.msra.mxu1 %v4083_v49  ;;  %1389 = vmatprep.mubr.f32.mxu1 %v3633_v17 }
  0xc6   :  { %2693 = vmatprep.subr.bf16.mxu0 %v2692_v56  ;;  %2717 = vmatprep.subr.bf16.mxu1 %v4084_v63  ;;  %v4091_v56 = vld [vmem:[#allocation23_spill] sm:$0xff] }
  0xc8   :  { %1391 = vmatmul.mubr.f32.gmra.mrb[14].mxu1 %v3652_v15  ;;  %2695 = vmatpush3.bf16.msra.mxu0 %v2694_v1  ;;  %v4092_v1 = vand.u32 4294901760, %v3328_v32  ;;  %v4099_v32 = vand.u32 4294901760, %v3408_v38  ;;  %v4104_v38 = vand.u32 4294901760, %v3439_v44  ;;  %v4110_v44 = vand.u32 4294901760, %v4082_v27 }
  0xc9   :  { %2719 = vmatpush3.bf16.msra.mxu1 %v3406_v23  ;;  %2697 = vmatprep.subr.bf16.mxu0 %v2696_v16  ;;  %v4093_v16 = vand.u32 4294901760, %v3330_v18  ;;  %v4100_v18 = vand.u32 4294901760, %v3410_v52  ;;  %v4105_v52 = vld [vmem:[#allocation18_spill] sm:$0xff]  ;;  %v4116_v27 = vand.u32 4294901760, %v3552_v8  ;;  %v4121_v8 = vand.u32 4294901760, %v4087_v11 }
  0xca   :  { %2721 = vmatprep.subr.bf16.mxu1 %v3425_v31  ;;  %1642 = vmatprep.mubr.f32.mxu1 %v4085_v5  ;;  %v4095_v5 = vand.u32 4294901760, %v3335_v48  ;;  %v4128_v11 = vand.u32 4294901760, %v3670_v14 }
  0xcb   :  { %v2750_v48 = vpack.c.bf16 %v4100_v18, %v4099_v32 }
  0xcc   :  { %2699 = vmatpush3.bf16.msra.mxu0 %v2698_v4  ;;  %v2744_v4 = vpack.c.bf16 %v4093_v16, %v4092_v1  ;;  %v4108_v16 = vand.u32 4294901760, %v3650_v47 }
  0xcd   :  { %2723 = vmatpush3.bf16.msra.mxu1 %v4086_v58  ;;  %2701 = vmatprep.subr.bf16.mxu0 %v2700_v37  ;;  %v4094_v37 = vld [vmem:[#allocation24_spill] sm:$0xff] }
  0xce   :  { %2725 = vmatprep.subr.bf16.mxu1 %v4088_v22 }
  0xd0   :  { %2703 = vmatpush3.bf16.msra.mxu0 %v2702_v40  ;;  %v4096_v40 = vand.u32 4294901760, %v3337_v42  ;;  %v4101_v42 = vand.u32 4294901760, %v3420_v50  ;;  %v4106_v50 = vand.u32 4294901760, %v4079_v34  ;;  %v4113_v34 = vand.u32 4294901760, %v3519_v19 }
  0xd1   :  { %2727 = vmatpush3.bf16.msra.mxu1 %v4089_v6  ;;  %2705 = vmatprep.subr.bf16.mxu0 %v2704_v7 }
  0xd2   :  { %2729 = vmatprep.subr.bf16.mxu1 %v4090_v45  ;;  %v2746_v7 = vpack.c.bf16 %v4096_v40, %v4095_v5  ;;  %v4111_v5 = vand.u32 4294901760, %v3662_v2 }
  0xd4   :  { %2707 = vmatpush3.bf16.msra.mxu0 %v2706_v24  ;;  %v4097_v24 = vand.u32 4294901760, %v3389_v46  ;;  %v4102_v46 = vand.u32 4294901760, %v3430_v26  ;;  %v4107_v26 = vand.u32 4294901760, %v4080_v54 }
  0xd5   :  { %2731 = vmatpush3.bf16.msra.mxu1 %v4091_v56  ;;  %2709 = vmatprep.subr.bf16.mxu0 %v2708_v61  ;;  %v4098_v61 = vand.u32 4294901760, %v3391_v51 }
  0xd6   :  { %2733 = vmatprep.subr.bf16.mxu1 %v4094_v37  ;;  %v2752_v51 = vpack.c.bf16 %v4102_v46, %v4101_v42 }
  0xd7   :  { %v2748_v41 = vpack.c.bf16 %v4098_v61, %v4097_v24 }
  0xd8   :  { %2711 = vmatpush3.bf16.msra.mxu0 %v2710_v9  ;;  %v4103_v9 = vand.u32 4294901760, %v3437_v0  ;;  %v4109_v0 = vand.u32 4294901760, %v4081_v21  ;;  %v4115_v21 = vand.u32 4294901760, %v3549_v35  ;;  %v4120_v35 = vand.u32 4294901760, %v3582_v57 }
  0xd9   :  { %2735 = vmatpush3.bf16.msra.mxu1 %v3564_v39  ;;  %2745 = vmatprep.subr.bf16.mxu0 %v2744_v4  ;;  %v4126_v57 = vand.u32 4294901760, %v3644_v60 }
  0xda   :  { %2737 = vmatprep.subr.bf16.mxu1 %v3590_v62  ;;  %v2754_v1 = vpack.c.bf16 %v4104_v38, %v4103_v9  ;;  %v2758_v4 = vpack.c.bf16 %v4110_v44, %v4109_v0 }
  0xdb   :  { %1529 = vmatmul.mubr.f32.vlgmr.msra.gmra.mrb[16].mxu0 %v3650_v47  ;;  %v4114_v47 = vand.u32 4294901760, %v3687_v3 }
  0xdc   :  { %2747 = vmatpush3.bf16.msra.mxu0 %v2746_v7  ;;  %1535 = vmatprep.mubr.f32.mxu0 %v3662_v2  ;;  %v4117_v2 = vand.u32 4294901760, %v3554_v20 }
  0xdd   :  { %2739 = vmatpush3.bf16.msra.mxu1 %v3604_v13  ;;  %2749 = vmatprep.subr.bf16.mxu0 %v2748_v41  ;;  %v2756_v41 = vpack.c.bf16 %v4107_v26, %v4106_v50 }
  0xde   :  { %2741 = vmatprep.subr.bf16.mxu1 %v3683_v36 }
  0xdf   :  { %1538 = vmatmul.mubr.f32.gmra.mrb[18].mxu0 %v3687_v3  ;;  %v4119_v3 = vand.u32 4294901760, %v3575_v25  ;;  %v4125_v25 = vand.u32 4294901760, %v3638_v29 }
  0xe0   :  { %2751 = vmatpush3.bf16.msra.mxu0 %v2750_v48  ;;  %1823 = vmatprep.mubr.f32.mxu0 %v4105_v52 }
  0xe1   :  { %2743 = vmatpush3.bf16.msra.mxu1 %v3712_v33  ;;  %2753 = vmatprep.subr.bf16.mxu0 %v2752_v51 }
  0xe2   :  { %2777 = vmatprep.subr.bf16.mxu1 %v4078_v53  ;;  %v4112_v53 = vand.u32 4294901760, %v3507_v28  ;;  %v4118_v28 = vand.u32 4294901760, %v3559_v30  ;;  %v4124_v30 = vand.u32 4294901760, %v3616_v55 }
  0xe4   :  { %1646 = vmatmul.mubr.f32.vlgmr.msra.gmra.mrb[16].mxu1 %v4108_v16  ;;  %2755 = vmatpush3.bf16.msra.mxu0 %v2754_v1  ;;  %v2760_v54 = vpack.c.bf16 %v4113_v34, %v4112_v53  ;;  %v2764_v19 = vpack.c.bf16 %v4118_v28, %v4117_v2 }
  0xe5   :  { %2779 = vmatpush3.bf16.msra.mxu1 %v4083_v49  ;;  %1653 = vmatprep.mubr.f32.mxu1 %v4111_v5  ;;  %v2762_v49 = vpack.c.bf16 %v4116_v27, %v4115_v21 }
  0xe6   :  { %2757 = vmatprep.subr.bf16.mxu0 %v2756_v41  ;;  %2781 = vmatprep.subr.bf16.mxu1 %v4084_v63  ;;  %v2766_v63 = vpack.c.bf16 %v4120_v35, %v4119_v3 }
  0xe8   :  { %1657 = vmatmul.mubr.f32.gmra.mrb[18].mxu1 %v4114_v47  ;;  %2759 = vmatpush3.bf16.msra.mxu0 %v2758_v4 }
  0xe9   :  { %2783 = vmatpush3.bf16.msra.mxu1 %v3406_v23  ;;  %2761 = vmatprep.subr.bf16.mxu0 %v2760_v54  ;;  %v4122_v23 = vand.u32 4294901760, %v3594_v43  ;;  %v4127_v43 = vand.u32 4294901760, %v3667_v59 }
  0xea   :  { %2785 = vmatprep.subr.bf16.mxu1 %v3425_v31  ;;  %1934 = vmatprep.mubr.f32.mxu1 %v4105_v52  ;;  %v4123_v31 = vand.u32 4294901760, %v3606_v12 }
  0xeb   :  { %v2768_v20 = vpack.c.bf16 %v4122_v23, %v4121_v8 }
  0xec   :  { %2763 = vmatpush3.bf16.msra.mxu0 %v2762_v49  ;;  %v2770_v40 = vpack.c.bf16 %v4124_v30, %v4123_v31 }
  0xed   :  { %2787 = vmatpush3.bf16.msra.mxu1 %v4086_v58  ;;  %2765 = vmatprep.subr.bf16.mxu0 %v2764_v19  ;;  %v2772_v58 = vpack.c.bf16 %v4126_v57, %v4125_v25 }
  0xee   :  { %2789 = vmatprep.subr.bf16.mxu1 %v4088_v22  ;;  %v2774_v22 = vpack.c.bf16 %v4128_v11, %v4127_v43 }
  0xf0   :  { %2767 = vmatpush3.bf16.msra.mxu0 %v2766_v63 }
  0xf1   :  { %2791 = vmatpush3.bf16.msra.mxu1 %v4089_v6  ;;  %2769 = vmatprep.subr.bf16.mxu0 %v2768_v20 }
  0xf2   :  { %2793 = vmatprep.subr.bf16.mxu1 %v4090_v45 }
  0xf4   :  { %2771 = vmatpush3.bf16.msra.mxu0 %v2770_v40 }
  0xf5   :  { %2795 = vmatpush3.bf16.msra.mxu1 %v4091_v56  ;;  %2773 = vmatprep.subr.bf16.mxu0 %v2772_v58 }
  0xf6   :  { %2797 = vmatprep.subr.bf16.mxu1 %v4094_v37 }
  0xf8   :  { %2775 = vmatpush3.bf16.msra.mxu0 %v2774_v22 }
  0xf9   :  { %2799 = vmatpush3.bf16.msra.mxu1 %v3564_v39 }
  0xfa   :  { %2801 = vmatprep.subr.bf16.mxu1 %v3590_v62 }
  0xfb   :  { %1825 = vmatmul.mubr.f32.vlgmr.msra.gmra.mrb[20].mxu0 %v3624_v10 }
  0xfc   :  { %1830 = vmatprep.mubr.f32.mxu0 %v3633_v17 }
  0xfd   :  { %2803 = vmatpush3.bf16.msra.mxu1 %v3604_v13 }
  0xfe   :  { %2805 = vmatprep.subr.bf16.mxu1 %v3683_v36 }
  0xff   :  { %1832 = vmatmul.mubr.f32.gmra.mrb[22].mxu0 %v3652_v15 }
 0x101   :  { %2807 = vmatpush3.bf16.msra.mxu1 %v3712_v33 }
 0x104   :  { %1936 = vmatmul.mubr.f32.vlgmr.msra.gmra.mrb[20].mxu1 %v3624_v10 }
 0x105   :  { %1941 = vmatprep.mubr.f32.mxu1 %v3633_v17 }
 0x108   :  { %1943 = vmatmul.mubr.f32.gmra.mrb[22].mxu1 %v3652_v15 }
 0x12e   :  { %v2000_v39 = vpop.f32.mrb[0].mxu0 }
 0x12f   :  { %v2001_v62 = vpop.f32.mrb[1].mxu0 }
 0x130   :  { %v2002_v12 = vadd.f32 %v2001_v62, %v2000_v39 }
 0x137   :  { %v2038_v55 = vpop.f32.mrb[0].mxu1 }
 0x138   :  { %v2039_v60 = vpop.f32.mrb[1].mxu1 }
 0x139   :  { %v2040_v29 = vadd.f32 %v2039_v60, %v2038_v55 }
 0x13b   :  { %v468_v59 = vadd.f32 %v2040_v29, %v2002_v12  ;;  %v2041_v13 = vpop.f32.mrb[2].mxu1 }
 0x13c   :  { %v2042_v14 = vpop.f32.mrb[3].mxu1 }
 0x13d   :  { %v2003_v36 = vpop.f32.mrb[2].mxu0  ;;  %v2043_v6 = vadd.f32 %v2042_v14, %v2041_v13 }
 0x13e   :  { %v2004_v45 = vpop.f32.mrb[3].mxu0 }
 0x13f   :  { %v2005_v56 = vadd.f32 %v2004_v45, %v2003_v36 }
 0x141   :  { %v475_v33 = vadd.f32 %v2043_v6, %v2005_v56 }
 0x14e   :  { %v2076_v37 = vpop.f32.mrb[4].mxu0 }
 0x14f   :  { %v2077_v10 = vpop.f32.mrb[5].mxu0 }
 0x150   :  { %v2078_v7 = vadd.f32 %v2077_v10, %v2076_v37 }
 0x152   :  { %v613_v17 = vadd.f32 %v2078_v7, %v468_v59  ;;  %v2079_v24 = vpop.f32.mrb[6].mxu0 }
 0x153   :  { %v2080_v15 = vpop.f32.mrb[7].mxu0 }
 0x154   :  { %v2081_v61 = vadd.f32 %v2080_v15, %v2079_v24 }
 0x156   :  { %v622_v32 = vadd.f32 %v2081_v61, %v475_v33 }
 0x157   :  { %v2114_v18 = vpop.f32.mrb[4].mxu1 }
 0x158   :  { %v2115_v48 = vpop.f32.mrb[5].mxu1 }
 0x159   :  { %v2116_v42 = vadd.f32 %v2115_v48, %v2114_v18 }
 0x15b   :  { %v730_v46 = vadd.f32 %v2116_v42, %v613_v17  ;;  %v2117_v51 = vpop.f32.mrb[6].mxu1 }
 0x15c   :  { %v2118_v9 = vpop.f32.mrb[7].mxu1 }
 0x15d   :  { %v2119_v38 = vadd.f32 %v2118_v9, %v2117_v51 }
 0x15f   :  { %v741_v1 = vadd.f32 %v2119_v38, %v622_v32 }
 0x16e   :  { %v2152_v52 = vpop.f32.mrb[8].mxu0 }
 0x16f   :  { %v2153_v50 = vpop.f32.mrb[9].mxu0 }
 0x170   :  { %v2154_v26 = vadd.f32 %v2153_v50, %v2152_v52 }
 0x172   :  { %v909_v41 = vadd.f32 %v2154_v26, %v730_v46  ;;  %v2155_v16 = vpop.f32.mrb[10].mxu0 }
 0x173   :  { %v2156_v0 = vpop.f32.mrb[11].mxu0 }
 0x174   :  { %v2157_v44 = vadd.f32 %v2156_v0, %v2155_v16 }
 0x176   :  { %v916_v4 = vadd.f32 %v2157_v44, %v741_v1 }
 0x177   :  { %v2190_v5 = vpop.f32.mrb[8].mxu1 }
 0x178   :  { %v2191_v53 = vpop.f32.mrb[9].mxu1 }
 0x179   :  { %v2192_v34 = vadd.f32 %v2191_v53, %v2190_v5 }
 0x17b   :  { %v1020_v54 = vadd.f32 %v2192_v34, %v909_v41  ;;  %v2193_v47 = vpop.f32.mrb[10].mxu1 }
 0x17c   :  { %v2194_v21 = vpop.f32.mrb[11].mxu1 }
 0x17d   :  { %v2195_v27 = vadd.f32 %v2194_v21, %v2193_v47 }
 0x17f   :  { %v1027_v49 = vadd.f32 %v2195_v27, %v916_v4 }
 0x18e   :  { %v2228_v2 = vpop.f32.mrb[12].mxu0 }
 0x18f   :  { %v2229_v28 = vpop.f32.mrb[13].mxu0 }
 0x190   :  { %v2230_v19 = vadd.f32 %v2229_v28, %v2228_v2 }
 0x192   :  { %v1139_v3 = vadd.f32 %v2230_v19, %v1020_v54  ;;  %v2231_v35 = vpop.f32.mrb[14].mxu0 }
 0x193   :  { %v2232_v63 = vpop.f32.mrb[15].mxu0 }
 0x194   :  { %v2233_v8 = vadd.f32 %v2232_v63, %v2231_v35 }
 0x196   :  { %v1154_v23 = vadd.f32 %v2233_v8, %v1027_v49 }
 0x197   :  { %v2266_v20 = vpop.f32.mrb[12].mxu1 }
 0x198   :  { %v2267_v31 = vpop.f32.mrb[13].mxu1 }
 0x199   :  { %v2268_v30 = vadd.f32 %v2267_v31, %v2266_v20 }
 0x19b   :  { %v1386_v40 = vadd.f32 %v2268_v30, %v1139_v3  ;;  %v2269_v25 = vpop.f32.mrb[14].mxu1 }
 0x19c   :  { %v2270_v57 = vpop.f32.mrb[15].mxu1 }
 0x19d   :  { %v2271_v58 = vadd.f32 %v2270_v57, %v2269_v25 }
 0x19f   :  { %v1393_v43 = vadd.f32 %v2271_v58, %v1154_v23 }
 0x1ae   :  { %v2304_v11 = vpop.f32.mrb[16].mxu0 }
 0x1af   :  { %v2305_v22 = vpop.f32.mrb[17].mxu0 }
 0x1b0   :  { %v2306_v39 = vadd.f32 %v2305_v22, %v2304_v11 }
 0x1b2   :  { %v1531_v62 = vadd.f32 %v2306_v39, %v1386_v40  ;;  %v2307_v12 = vpop.f32.mrb[18].mxu0 }
 0x1b3   :  { %v2308_v55 = vpop.f32.mrb[19].mxu0 }
 0x1b4   :  { %v2309_v60 = vadd.f32 %v2308_v55, %v2307_v12 }
 0x1b6   :  { %v1540_v29 = vadd.f32 %v2309_v60, %v1393_v43 }
 0x1b7   :  { %v2342_v59 = vpop.f32.mrb[16].mxu1 }
 0x1b8   :  { %v2343_v13 = vpop.f32.mrb[17].mxu1 }
 0x1b9   :  { %v2344_v14 = vadd.f32 %v2343_v13, %v2342_v59 }
 0x1bb   :  { %v1648_v36 = vadd.f32 %v2344_v14, %v1531_v62  ;;  %v2345_v6 = vpop.f32.mrb[18].mxu1 }
 0x1bc   :  { %v2346_v45 = vpop.f32.mrb[19].mxu1 }
 0x1bd   :  { %v2347_v56 = vadd.f32 %v2346_v45, %v2345_v6 }
 0x1bf   :  { %v1659_v33 = vadd.f32 %v2347_v56, %v1540_v29 }
 0x1ce   :  { %v2380_v37 = vpop.f32.mrb[20].mxu0 }
 0x1cf   :  { %v2381_v10 = vpop.f32.mrb[21].mxu0 }
 0x1d0   :  { %v2382_v7 = vadd.f32 %v2381_v10, %v2380_v37 }
 0x1d2   :  { %v1827_v17 = vadd.f32 %v2382_v7, %v1648_v36  ;;  %v2383_v24 = vpop.f32.mrb[22].mxu0 }
 0x1d3   :  { %v2384_v15 = vpop.f32.mrb[23].mxu0 }
 0x1d4   :  { %v2385_v61 = vadd.f32 %v2384_v15, %v2383_v24 }
 0x1d6   :  { %v1834_v32 = vadd.f32 %v2385_v61, %v1659_v33 }
 0x1d7   :  { %v2418_v18 = vpop.f32.mrb[20].mxu1 }
 0x1d8   :  { %v2419_v48 = vpop.f32.mrb[21].mxu1 }
 0x1d9   :  { %v2420_v42 = vadd.f32 %v2419_v48, %v2418_v18 }
 0x1db   :  { %v1938_v46 = vadd.f32 %v2420_v42, %v1827_v17  ;;  %v2421_v51 = vpop.f32.mrb[22].mxu1 }
 0x1dc   :  { %v2422_v9 = vpop.f32.mrb[23].mxu1 }
 0x1dd   :  { %1948 = vst [vmem:[#allocation7] sm:$0xff] %v1938_v46  ;;  %v2423_v38 = vadd.f32 %v2422_v9, %v2421_v51 }
 0x1df   :  { %v1945_v1 = vadd.f32 %v2423_v38, %v1834_v32 }
 0x1e1   :  { %1949 = vst [vmem:[#allocation7 + $0x8] sm:$0xff] %v1945_v1 }
 0x1e2   :  { %2870 = shalt.err (!%p2867_p6)
}
 0x1e3   :  { %s2871_s12 = scalar_lea.hbm %s3896_s2, 256 }
 0x1e4   :  { %p2872_p7 = scmp.ne.s32.totalorder %s3896_s2, %s2871_s12  ;;  %p2875_p8 = scmp.lt.u32.totalorder %s2871_s12, %s3896_s2 }
 0x1e6   :  { %p2877_p9 = pnand %p2875_p8, %p2872_p7 }
 0x1e8   :  { %2880 = shalt.err (!%p2877_p9)
}
 0x1e9   :  { %1961 = dma.vmem_to_hbm [thread:$0]  %s1956_s8, 256, %s3896_s2, [#allocation4], %s2891_s0, %s2891_s0, %s2892_s5  }
 0x1ea   :  { %2885 = dma.done.wait [#allocation4], 256  }
 0x1eb   :  { %2886 = vsyncadd [#allocation4], 4294967040 }
 0x1ec   :  { %1965 = vsyncpa [#allocation3], 1 }
 0x1ed   :  { %1966 = vsyncpa [#allocation6], 1 }
 0x1ee   :  { %1967 = vsyncpa [#allocation4], 1 }

</bundles_post_ra>
